<compile_context>
chip_gen: v7x
topology: tpu7x:2x2x1
jax: 0.10.0
libtpu: 0.0.40
codegen_flags: <defaults>
</compile_context>

<pallas_src>
import jax
import jax.numpy as jnp
from jax.experimental import pallas as pl
from jax.experimental.pallas import tpu as pltpu


def _round_up(a, b):
    return ((a + b - 1) // b) * b


def _smoe_fused_kernel(x_ref, gates_ref, bias_ref, w1_ref, w2_ref, b1_ref, out_ref):
    """One grid step = one token tile; all E experts fused into two wide matmuls.

    x_ref     : (TN, dim)        bf16
    gates_ref : (E, TN, 1)       f32   per-expert routing-gate columns
    bias_ref  : (TN, dim)        f32   precomputed sum_e g_e * b2[e]
    w1_ref    : (dim, E*2*d_ff)  bf16  all experts, VMEM-resident
    w2_ref    : (E*d_ff, dim)    bf16  all experts, VMEM-resident
    b1_ref    : (1, E*2*d_ff)    f32   all experts, VMEM-resident
    out_ref   : (TN, dim)        x.dtype
    """
    E = gates_ref.shape[0]
    d_ff2 = w1_ref.shape[-1] // E
    d_ff = d_ff2 // 2

    x = x_ref[...]                                               # (TN, dim) bf16
    # First matmul: all experts at once -> full MXU output-width fill.
    h = jnp.dot(x, w1_ref[...], preferred_element_type=jnp.float32) + b1_ref[...]

    # silu_and_mul per expert; fold the routing gate into the activation in f32,
    # then cast to bf16 and concatenate along the contraction dim of matmul #2.
    pieces = []
    for e in range(E):                                           # small static E -> unrolled
        he = h[:, e * d_ff2:(e + 1) * d_ff2]                     # lane-aligned slice
        act = jax.nn.silu(he[:, :d_ff]) * he[:, d_ff:]           # (TN, d_ff) f32, EUP
        g = gates_ref[e]                                         # (TN, 1) f32
        pieces.append((g * act).astype(w2_ref.dtype))
    act_fused = jnp.concatenate(pieces, axis=-1)                 # (TN, E*d_ff) bf16

    # Second matmul: gated expert outputs accumulate in the MXU f32 accumulator.
    y = jnp.dot(act_fused, w2_ref[...], preferred_element_type=jnp.float32)
    out_ref[...] = (y + bias_ref[...]).astype(out_ref.dtype)


def smoe_forward(x, params, k, *, tile_n=512):
    B, T, dim = x.shape
    w1, b1, w2, b2 = params["w1"], params["b1"], params["w2"], params["b2"]
    E, _, d_ff2 = w1.shape
    d_ff = d_ff2 // 2
    assert dim % 128 == 0 and d_ff % 128 == 0, "lane-aligned dim/d_ff expected"

    xf = x.reshape(B * T, dim)
    N = xf.shape[0]

    # --- gating (tiny, data-dependent routing) in plain JAX, carried in f32 ---
    logits = xf.astype(jnp.float32) @ params["wg"] + params["bg"]      # (N, E)
    top_w, top_idx = jax.lax.top_k(logits, k)                          # (N, k)
    top_w = jax.nn.softmax(top_w, axis=-1)
    gates = jnp.sum(
        top_w[..., None] * jax.nn.one_hot(top_idx, E, dtype=jnp.float32), axis=1
    )                                                                  # (N, E) dense, f32

    # b2 hoisted out of the kernel: sum_e g_e*b2_e == gates @ b2 (tiny matmul).
    bias2 = gates @ b2                                                 # (N, dim) f32

    # --- token tiling: bf16 sublane multiple of 16; prefer >=2 tiles (v7x) ---
    TN = min(tile_n, _round_up(N, 16))
    if _round_up(N, TN) // TN == 1 and N > 16:
        TN = _round_up((N + 1) // 2, 16)
    N_pad = _round_up(N, TN)
    if N_pad != N:
        xf = jnp.pad(xf, ((0, N_pad - N), (0, 0)))
        gates = jnp.pad(gates, ((0, N_pad - N), (0, 0)))
        bias2 = jnp.pad(bias2, ((0, N_pad - N), (0, 0)))
    n_tiles = N_pad // TN

    gates_e = gates.T.reshape(E, N_pad, 1)              # per-expert gate columns

    # bf16 MXU operands; expert weights pre-fused for the two wide matmuls.
    xf_bf = xf.astype(jnp.bfloat16)
    w1f = jnp.transpose(w1, (1, 0, 2)).reshape(dim, E * d_ff2).astype(jnp.bfloat16)
    w2f = w2.reshape(E * d_ff, dim).astype(jnp.bfloat16)
    b1f = b1.reshape(1, E * d_ff2)

    out_dtype = x.dtype
    out_bytes = jnp.dtype(out_dtype).itemsize

    # VMEM budget: resident weights + double-buffered tiles + f32 intermediates.
    work_set = (
        (dim * E * d_ff2 + E * d_ff * dim) * 2 + E * d_ff2 * 4            # w1f, w2f, b1f
        + 2 * TN * (dim * 2 + dim * 4 + dim * out_bytes + E * 4)          # x, bias2, out, gates (db)
        + TN * E * d_ff2 * 4 + TN * E * d_ff * (4 + 2)                    # h, act, act_fused
    )
    vmem_limit = min(max(int(1.5 * work_set) + (2 << 20), 16 << 20), 64 << 20)

    out = pl.pallas_call(
        _smoe_fused_kernel,
        out_shape=jax.ShapeDtypeStruct((N_pad, dim), out_dtype),
        grid_spec=pltpu.PrefetchScalarGridSpec(
            num_scalar_prefetch=0,
            grid=(n_tiles,),
            in_specs=[
                pl.BlockSpec((TN, dim), lambda n: (n, 0)),             # x tile
                pl.BlockSpec((E, TN, 1), lambda n: (0, n, 0)),         # gate columns
                pl.BlockSpec((TN, dim), lambda n: (n, 0)),             # gates @ b2 tile
                pl.BlockSpec((dim, E * d_ff2), lambda n: (0, 0)),      # w1 fused (resident)
                pl.BlockSpec((E * d_ff, dim), lambda n: (0, 0)),       # w2 fused (resident)
                pl.BlockSpec((1, E * d_ff2), lambda n: (0, 0)),        # b1 fused (resident)
            ],
            out_specs=pl.BlockSpec((TN, dim), lambda n: (n, 0)),
        ),
        compiler_params=pltpu.CompilerParams(
            dimension_semantics=("parallel",),
            vmem_limit_bytes=vmem_limit,
        ),
    )(xf_bf, gates_e, bias2, w1f, w2f, b1f)

    return out[:N].reshape(B, T, dim)


def smoe_reference(x, params, k):
    """Pure-JAX f32 reference mirroring the PyTorch SMoE forward."""
    B, T, dim = x.shape
    xf = x.reshape(-1, dim).astype(jnp.float32)
    logits = xf @ params["wg"] + params["bg"]
    top_w, top_idx = jax.lax.top_k(logits, k)
    top_w = jax.nn.softmax(top_w, axis=-1)
    out = jnp.zeros_like(xf)
    E = params["w1"].shape[0]
    for e in range(E):
        h = xf @ params["w1"][e] + params["b1"][e]
        d = h.shape[-1] // 2
        act = jax.nn.silu(h[:, :d]) * h[:, d:]
        y = act @ params["w2"][e] + params["b2"][e]
        g = jnp.sum(jnp.where(top_idx == e, top_w, 0.0), axis=-1, keepdims=True)
        out = out + g * y
    return out.astype(x.dtype).reshape(B, T, dim)


def init_params(key, dim, d_ff, n_experts):
    ks = jax.random.split(key, 6)
    scale = 0.05
    return {
        "wg": scale * jax.random.normal(ks[0], (dim, n_experts), jnp.float32),
        "bg": scale * jax.random.normal(ks[1], (n_experts,), jnp.float32),
        "w1": scale * jax.random.normal(ks[2], (n_experts, dim, 2 * d_ff), jnp.float32),
        "b1": scale * jax.random.normal(ks[3], (n_experts, 2 * d_ff), jnp.float32),
        "w2": scale * jax.random.normal(ks[4], (n_experts, d_ff, dim), jnp.float32),
        "b2": scale * jax.random.normal(ks[5], (n_experts, dim), jnp.float32),
    }


if __name__ == "__main__":
    # Small shapes consistent with the module defaults:
    # batch=2, seq=8, dim=128, d_ff=256, num_experts=8, k=2.
    B, T, DIM, D_FF, E, K = 2, 8, 128, 256, 8, 2

    key = jax.random.PRNGKey(0)
    k_x, k_p = jax.random.split(key)
    x = jax.random.normal(k_x, (B, T, DIM), jnp.float32)
    params = init_params(k_p, DIM, D_FF, E)

    out = smoe_forward(x, params, K)
    out = jax.block_until_ready(out)

    ref = smoe_reference(x, params, K)
    assert out.shape == (B, T, DIM)
    # bf16 matmul operands (f32 accumulation) vs the f32 reference -> loose tol.
    assert jnp.allclose(out, ref, rtol=2e-2, atol=2e-2), "mismatch vs reference"

    print("KERNEL_OK")
</pallas_src>

<mosaic_0001>
module attributes {stable_mosaic.version = 11 : i64} {
  func.func @_smoe_fused_kernel(%arg0: i32, %arg1: memref<16x128xbf16, #tpu.memory_space<vmem>>, %arg2: memref<8x16x1xf32, #tpu.memory_space<vmem>>, %arg3: memref<16x128xf32, #tpu.memory_space<vmem>>, %arg4: memref<128x4096xbf16, #tpu.memory_space<vmem>>, %arg5: memref<2048x128xbf16, #tpu.memory_space<vmem>>, %arg6: memref<1x4096xf32, #tpu.memory_space<vmem>>, %arg7: memref<16x128xf32, #tpu.memory_space<vmem>>) attributes {dimension_semantics = [#tpu.dimension_semantics<parallel>], iteration_bounds = array<i64: 1>, scalar_prefetch = 0 : i64, scratch_operands = 0 : i64, tpu.core_type = #tpu.core_type<tc>, window_params = [{transform_indices = @transform_0, window_bounds = array<i64: 16, 128>}, {transform_indices = @transform_1, window_bounds = array<i64: 8, 16, 1>}, {transform_indices = @transform_2, window_bounds = array<i64: 16, 128>}, {pipeline_mode = #tpu.pipeline_mode<synchronous>, transform_indices = @transform_3, window_bounds = array<i64: 128, 4096>}, {pipeline_mode = #tpu.pipeline_mode<synchronous>, transform_indices = @transform_4, window_bounds = array<i64: 2048, 128>}, {pipeline_mode = #tpu.pipeline_mode<synchronous>, transform_indices = @transform_5, window_bounds = array<i64: 1, 4096>}, {transform_indices = @transform_6, window_bounds = array<i64: 16, 128>}]} {
    %c0 = arith.constant 0 : index
    %c0_0 = arith.constant 0 : index
    %0 = vector.load %arg1[%c0, %c0_0] : memref<16x128xbf16, #tpu.memory_space<vmem>>, vector<16x128xbf16>
    %c0_1 = arith.constant 0 : index
    %c0_2 = arith.constant 0 : index
    %1 = vector.load %arg4[%c0_1, %c0_2] : memref<128x4096xbf16, #tpu.memory_space<vmem>>, vector<128x4096xbf16>
    %cst = arith.constant dense<0.000000e+00> : vector<16x4096xf32>
    %2 = tpu.matmul %0, %1, %cst {dimension_numbers = #tpu.dot_dimension_numbers<[1], [0], [0], [1], [0, 0, 1, 1], [], []>} : vector<16x128xbf16>, vector<128x4096xbf16>, vector<16x4096xf32> -> vector<16x4096xf32>
    %c0_3 = arith.constant 0 : index
    %c0_4 = arith.constant 0 : index
    %3 = vector.load %arg6[%c0_3, %c0_4] : memref<1x4096xf32, #tpu.memory_space<vmem>>, vector<1x4096xf32>
    %4 = vector.broadcast %3 : vector<1x4096xf32> to vector<16x4096xf32>
    %5 = arith.addf %2, %4 : vector<16x4096xf32>
    %6 = vector.extract_strided_slice %5 {offsets = [0, 0], sizes = [16, 512], strides = [1, 1]} : vector<16x4096xf32> to vector<16x512xf32>
    %7 = vector.extract_strided_slice %6 {offsets = [0, 0], sizes = [16, 256], strides = [1, 1]} : vector<16x512xf32> to vector<16x256xf32>
    %8 = arith.negf %7 : vector<16x256xf32>
    %9 = math.exp %8 : vector<16x256xf32>
    %cst_5 = arith.constant 1.000000e+00 : f32
    %10 = vector.broadcast %cst_5 : f32 to vector<16x256xf32>
    %11 = arith.addf %10, %9 : vector<16x256xf32>
    %12 = arith.divf %10, %11 : vector<16x256xf32>
    %13 = arith.mulf %7, %12 : vector<16x256xf32>
    %14 = vector.extract_strided_slice %6 {offsets = [0, 256], sizes = [16, 256], strides = [1, 1]} : vector<16x512xf32> to vector<16x256xf32>
    %15 = arith.mulf %13, %14 : vector<16x256xf32>
    %c0_6 = arith.constant 0 : index
    %c0_7 = arith.constant 0 : index
    %c0_8 = arith.constant 0 : index
    %16 = vector.load %arg2[%c0_6, %c0_7, %c0_8] : memref<8x16x1xf32, #tpu.memory_space<vmem>>, vector<1x16x1xf32>
    %17 = vector.shape_cast %16 : vector<1x16x1xf32> to vector<16x1xf32>
    %18 = vector.broadcast %17 : vector<16x1xf32> to vector<16x256xf32>
    %19 = arith.mulf %18, %15 : vector<16x256xf32>
    %20 = arith.truncf %19 : vector<16x256xf32> to vector<16x256xbf16>
    %21 = vector.extract_strided_slice %5 {offsets = [0, 512], sizes = [16, 512], strides = [1, 1]} : vector<16x4096xf32> to vector<16x512xf32>
    %22 = vector.extract_strided_slice %21 {offsets = [0, 0], sizes = [16, 256], strides = [1, 1]} : vector<16x512xf32> to vector<16x256xf32>
    %23 = arith.negf %22 : vector<16x256xf32>
    %24 = math.exp %23 : vector<16x256xf32>
    %cst_9 = arith.constant 1.000000e+00 : f32
    %25 = vector.broadcast %cst_9 : f32 to vector<16x256xf32>
    %26 = arith.addf %25, %24 : vector<16x256xf32>
    %27 = arith.divf %25, %26 : vector<16x256xf32>
    %28 = arith.mulf %22, %27 : vector<16x256xf32>
    %29 = vector.extract_strided_slice %21 {offsets = [0, 256], sizes = [16, 256], strides = [1, 1]} : vector<16x512xf32> to vector<16x256xf32>
    %30 = arith.mulf %28, %29 : vector<16x256xf32>
    %c1 = arith.constant 1 : index
    %c0_10 = arith.constant 0 : index
    %c0_11 = arith.constant 0 : index
    %31 = vector.load %arg2[%c1, %c0_10, %c0_11] : memref<8x16x1xf32, #tpu.memory_space<vmem>>, vector<1x16x1xf32>
    %32 = vector.shape_cast %31 : vector<1x16x1xf32> to vector<16x1xf32>
    %33 = vector.broadcast %32 : vector<16x1xf32> to vector<16x256xf32>
    %34 = arith.mulf %33, %30 : vector<16x256xf32>
    %35 = arith.truncf %34 : vector<16x256xf32> to vector<16x256xbf16>
    %36 = vector.extract_strided_slice %5 {offsets = [0, 1024], sizes = [16, 512], strides = [1, 1]} : vector<16x4096xf32> to vector<16x512xf32>
    %37 = vector.extract_strided_slice %36 {offsets = [0, 0], sizes = [16, 256], strides = [1, 1]} : vector<16x512xf32> to vector<16x256xf32>
    %38 = arith.negf %37 : vector<16x256xf32>
    %39 = math.exp %38 : vector<16x256xf32>
    %cst_12 = arith.constant 1.000000e+00 : f32
    %40 = vector.broadcast %cst_12 : f32 to vector<16x256xf32>
    %41 = arith.addf %40, %39 : vector<16x256xf32>
    %42 = arith.divf %40, %41 : vector<16x256xf32>
    %43 = arith.mulf %37, %42 : vector<16x256xf32>
    %44 = vector.extract_strided_slice %36 {offsets = [0, 256], sizes = [16, 256], strides = [1, 1]} : vector<16x512xf32> to vector<16x256xf32>
    %45 = arith.mulf %43, %44 : vector<16x256xf32>
    %c2 = arith.constant 2 : index
    %c0_13 = arith.constant 0 : index
    %c0_14 = arith.constant 0 : index
    %46 = vector.load %arg2[%c2, %c0_13, %c0_14] : memref<8x16x1xf32, #tpu.memory_space<vmem>>, vector<1x16x1xf32>
    %47 = vector.shape_cast %46 : vector<1x16x1xf32> to vector<16x1xf32>
    %48 = vector.broadcast %47 : vector<16x1xf32> to vector<16x256xf32>
    %49 = arith.mulf %48, %45 : vector<16x256xf32>
    %50 = arith.truncf %49 : vector<16x256xf32> to vector<16x256xbf16>
    %51 = vector.extract_strided_slice %5 {offsets = [0, 1536], sizes = [16, 512], strides = [1, 1]} : vector<16x4096xf32> to vector<16x512xf32>
    %52 = vector.extract_strided_slice %51 {offsets = [0, 0], sizes = [16, 256], strides = [1, 1]} : vector<16x512xf32> to vector<16x256xf32>
    %53 = arith.negf %52 : vector<16x256xf32>
    %54 = math.exp %53 : vector<16x256xf32>
    %cst_15 = arith.constant 1.000000e+00 : f32
    %55 = vector.broadcast %cst_15 : f32 to vector<16x256xf32>
    %56 = arith.addf %55, %54 : vector<16x256xf32>
    %57 = arith.divf %55, %56 : vector<16x256xf32>
    %58 = arith.mulf %52, %57 : vector<16x256xf32>
    %59 = vector.extract_strided_slice %51 {offsets = [0, 256], sizes = [16, 256], strides = [1, 1]} : vector<16x512xf32> to vector<16x256xf32>
    %60 = arith.mulf %58, %59 : vector<16x256xf32>
    %c3 = arith.constant 3 : index
    %c0_16 = arith.constant 0 : index
    %c0_17 = arith.constant 0 : index
    %61 = vector.load %arg2[%c3, %c0_16, %c0_17] : memref<8x16x1xf32, #tpu.memory_space<vmem>>, vector<1x16x1xf32>
    %62 = vector.shape_cast %61 : vector<1x16x1xf32> to vector<16x1xf32>
    %63 = vector.broadcast %62 : vector<16x1xf32> to vector<16x256xf32>
    %64 = arith.mulf %63, %60 : vector<16x256xf32>
    %65 = arith.truncf %64 : vector<16x256xf32> to vector<16x256xbf16>
    %66 = vector.extract_strided_slice %5 {offsets = [0, 2048], sizes = [16, 512], strides = [1, 1]} : vector<16x4096xf32> to vector<16x512xf32>
    %67 = vector.extract_strided_slice %66 {offsets = [0, 0], sizes = [16, 256], strides = [1, 1]} : vector<16x512xf32> to vector<16x256xf32>
    %68 = arith.negf %67 : vector<16x256xf32>
    %69 = math.exp %68 : vector<16x256xf32>
    %cst_18 = arith.constant 1.000000e+00 : f32
    %70 = vector.broadcast %cst_18 : f32 to vector<16x256xf32>
    %71 = arith.addf %70, %69 : vector<16x256xf32>
    %72 = arith.divf %70, %71 : vector<16x256xf32>
    %73 = arith.mulf %67, %72 : vector<16x256xf32>
    %74 = vector.extract_strided_slice %66 {offsets = [0, 256], sizes = [16, 256], strides = [1, 1]} : vector<16x512xf32> to vector<16x256xf32>
    %75 = arith.mulf %73, %74 : vector<16x256xf32>
    %c4 = arith.constant 4 : index
    %c0_19 = arith.constant 0 : index
    %c0_20 = arith.constant 0 : index
    %76 = vector.load %arg2[%c4, %c0_19, %c0_20] : memref<8x16x1xf32, #tpu.memory_space<vmem>>, vector<1x16x1xf32>
    %77 = vector.shape_cast %76 : vector<1x16x1xf32> to vector<16x1xf32>
    %78 = vector.broadcast %77 : vector<16x1xf32> to vector<16x256xf32>
    %79 = arith.mulf %78, %75 : vector<16x256xf32>
    %80 = arith.truncf %79 : vector<16x256xf32> to vector<16x256xbf16>
    %81 = vector.extract_strided_slice %5 {offsets = [0, 2560], sizes = [16, 512], strides = [1, 1]} : vector<16x4096xf32> to vector<16x512xf32>
    %82 = vector.extract_strided_slice %81 {offsets = [0, 0], sizes = [16, 256], strides = [1, 1]} : vector<16x512xf32> to vector<16x256xf32>
    %83 = arith.negf %82 : vector<16x256xf32>
    %84 = math.exp %83 : vector<16x256xf32>
    %cst_21 = arith.constant 1.000000e+00 : f32
    %85 = vector.broadcast %cst_21 : f32 to vector<16x256xf32>
    %86 = arith.addf %85, %84 : vector<16x256xf32>
    %87 = arith.divf %85, %86 : vector<16x256xf32>
    %88 = arith.mulf %82, %87 : vector<16x256xf32>
    %89 = vector.extract_strided_slice %81 {offsets = [0, 256], sizes = [16, 256], strides = [1, 1]} : vector<16x512xf32> to vector<16x256xf32>
    %90 = arith.mulf %88, %89 : vector<16x256xf32>
    %c5 = arith.constant 5 : index
    %c0_22 = arith.constant 0 : index
    %c0_23 = arith.constant 0 : index
    %91 = vector.load %arg2[%c5, %c0_22, %c0_23] : memref<8x16x1xf32, #tpu.memory_space<vmem>>, vector<1x16x1xf32>
    %92 = vector.shape_cast %91 : vector<1x16x1xf32> to vector<16x1xf32>
    %93 = vector.broadcast %92 : vector<16x1xf32> to vector<16x256xf32>
    %94 = arith.mulf %93, %90 : vector<16x256xf32>
    %95 = arith.truncf %94 : vector<16x256xf32> to vector<16x256xbf16>
    %96 = vector.extract_strided_slice %5 {offsets = [0, 3072], sizes = [16, 512], strides = [1, 1]} : vector<16x4096xf32> to vector<16x512xf32>
    %97 = vector.extract_strided_slice %96 {offsets = [0, 0], sizes = [16, 256], strides = [1, 1]} : vector<16x512xf32> to vector<16x256xf32>
    %98 = arith.negf %97 : vector<16x256xf32>
    %99 = math.exp %98 : vector<16x256xf32>
    %cst_24 = arith.constant 1.000000e+00 : f32
    %100 = vector.broadcast %cst_24 : f32 to vector<16x256xf32>
    %101 = arith.addf %100, %99 : vector<16x256xf32>
    %102 = arith.divf %100, %101 : vector<16x256xf32>
    %103 = arith.mulf %97, %102 : vector<16x256xf32>
    %104 = vector.extract_strided_slice %96 {offsets = [0, 256], sizes = [16, 256], strides = [1, 1]} : vector<16x512xf32> to vector<16x256xf32>
    %105 = arith.mulf %103, %104 : vector<16x256xf32>
    %c6 = arith.constant 6 : index
    %c0_25 = arith.constant 0 : index
    %c0_26 = arith.constant 0 : index
    %106 = vector.load %arg2[%c6, %c0_25, %c0_26] : memref<8x16x1xf32, #tpu.memory_space<vmem>>, vector<1x16x1xf32>
    %107 = vector.shape_cast %106 : vector<1x16x1xf32> to vector<16x1xf32>
    %108 = vector.broadcast %107 : vector<16x1xf32> to vector<16x256xf32>
    %109 = arith.mulf %108, %105 : vector<16x256xf32>
    %110 = arith.truncf %109 : vector<16x256xf32> to vector<16x256xbf16>
    %111 = vector.extract_strided_slice %5 {offsets = [0, 3584], sizes = [16, 512], strides = [1, 1]} : vector<16x4096xf32> to vector<16x512xf32>
    %112 = vector.extract_strided_slice %111 {offsets = [0, 0], sizes = [16, 256], strides = [1, 1]} : vector<16x512xf32> to vector<16x256xf32>
    %113 = arith.negf %112 : vector<16x256xf32>
    %114 = math.exp %113 : vector<16x256xf32>
    %cst_27 = arith.constant 1.000000e+00 : f32
    %115 = vector.broadcast %cst_27 : f32 to vector<16x256xf32>
    %116 = arith.addf %115, %114 : vector<16x256xf32>
    %117 = arith.divf %115, %116 : vector<16x256xf32>
    %118 = arith.mulf %112, %117 : vector<16x256xf32>
    %119 = vector.extract_strided_slice %111 {offsets = [0, 256], sizes = [16, 256], strides = [1, 1]} : vector<16x512xf32> to vector<16x256xf32>
    %120 = arith.mulf %118, %119 : vector<16x256xf32>
    %c7 = arith.constant 7 : index
    %c0_28 = arith.constant 0 : index
    %c0_29 = arith.constant 0 : index
    %121 = vector.load %arg2[%c7, %c0_28, %c0_29] : memref<8x16x1xf32, #tpu.memory_space<vmem>>, vector<1x16x1xf32>
    %122 = vector.shape_cast %121 : vector<1x16x1xf32> to vector<16x1xf32>
    %123 = vector.broadcast %122 : vector<16x1xf32> to vector<16x256xf32>
    %124 = arith.mulf %123, %120 : vector<16x256xf32>
    %125 = arith.truncf %124 : vector<16x256xf32> to vector<16x256xbf16>
    %126 = tpu.concatenate %20, %35, %50, %65, %80, %95, %110, %125 in 1 : vector<16x256xbf16>, vector<16x256xbf16>, vector<16x256xbf16>, vector<16x256xbf16>, vector<16x256xbf16>, vector<16x256xbf16>, vector<16x256xbf16>, vector<16x256xbf16> -> vector<16x2048xbf16>
    %c0_30 = arith.constant 0 : index
    %c0_31 = arith.constant 0 : index
    %127 = vector.load %arg5[%c0_30, %c0_31] : memref<2048x128xbf16, #tpu.memory_space<vmem>>, vector<2048x128xbf16>
    %cst_32 = arith.constant dense<0.000000e+00> : vector<16x128xf32>
    %128 = tpu.matmul %126, %127, %cst_32 {dimension_numbers = #tpu.dot_dimension_numbers<[1], [0], [0], [1], [0, 0, 1, 1], [], []>} : vector<16x2048xbf16>, vector<2048x128xbf16>, vector<16x128xf32> -> vector<16x128xf32>
    %c0_33 = arith.constant 0 : index
    %c0_34 = arith.constant 0 : index
    %129 = vector.load %arg3[%c0_33, %c0_34] : memref<16x128xf32, #tpu.memory_space<vmem>>, vector<16x128xf32>
    %130 = arith.addf %128, %129 : vector<16x128xf32>
    %c0_35 = arith.constant 0 : index
    %c0_36 = arith.constant 0 : index
    %131 = vector.load %arg7[%c0_35, %c0_36] : memref<16x128xf32, #tpu.memory_space<vmem>>, vector<16x128xf32>
    tpu.vector_store %arg7[%c0_35, %c0_36], %130 {strides = array<i32>} : memref<16x128xf32, #tpu.memory_space<vmem>>, vector<16x128xf32>,
    return
  }
  func.func @transform_0(%arg0: i32) -> (i32, i32) {
    %c0_i32 = arith.constant 0 : i32
    %c0_i32_0 = arith.constant 0 : i32
    return %arg0, %c0_i32 : i32, i32
  }
  func.func @transform_1(%arg0: i32) -> (i32, i32, i32) {
    %c0_i32 = arith.constant 0 : i32
    %c0_i32_0 = arith.constant 0 : i32
    %c0_i32_1 = arith.constant 0 : i32
    return %c0_i32, %arg0, %c0_i32_0 : i32, i32, i32
  }
  func.func @transform_2(%arg0: i32) -> (i32, i32) {
    %c0_i32 = arith.constant 0 : i32
    %c0_i32_0 = arith.constant 0 : i32
    return %arg0, %c0_i32 : i32, i32
  }
  func.func @transform_3(%arg0: i32) -> (i32, i32) {
    %c0_i32 = arith.constant 0 : i32
    %c0_i32_0 = arith.constant 0 : i32
    %c0_i32_1 = arith.constant 0 : i32
    return %c0_i32, %c0_i32_0 : i32, i32
  }
  func.func @transform_4(%arg0: i32) -> (i32, i32) {
    %c0_i32 = arith.constant 0 : i32
    %c0_i32_0 = arith.constant 0 : i32
    %c0_i32_1 = arith.constant 0 : i32
    return %c0_i32, %c0_i32_0 : i32, i32
  }
  func.func @transform_5(%arg0: i32) -> (i32, i32) {
    %c0_i32 = arith.constant 0 : i32
    %c0_i32_0 = arith.constant 0 : i32
    %c0_i32_1 = arith.constant 0 : i32
    return %c0_i32, %c0_i32_0 : i32, i32
  }
  func.func @transform_6(%arg0: i32) -> (i32, i32) {
    %c0_i32 = arith.constant 0 : i32
    %c0_i32_0 = arith.constant 0 : i32
    return %arg0, %c0_i32 : i32, i32
  }
}

</mosaic_0001>

<bundles_post_ra>
// kernel: tpu_custom_call.1
= control target key start
LH: loop header
LB: loop body
LE: loop exit
PB: predicated region body
PF: predicated region fallthrough
CT: control target
= control target key end

     0   :  { %11 = vsyncpa [#allocation3], 0  ;;  %s5600_s0 = inlined_call_operand.vmem [shape: bf16[16,128], index: 0, kind: input, shape index: {}]   ;;  %s5601_s1 = inlined_call_operand.vmem [shape: f32[8,16,1], index: 1, kind: input, shape index: {}]   ;;  %s5602_s2 = inlined_call_operand.vmem [shape: f32[16,128], index: 2, kind: input, shape index: {}]   ;;  %s5603_s3 = inlined_call_operand.hbm [shape: bf16[128,4096], index: 3, kind: input, shape index: {}]   ;;  %s5604_s4 = inlined_call_operand.hbm [shape: bf16[2048,128], index: 4, kind: input, shape index: {}]   ;;  %s5605_s5 = inlined_call_operand.vmem [shape: f32[1,4096], index: 5, kind: input, shape index: {}]   ;;  %s5606_s6 = inlined_call_operand.hbm [shape: f32[16,128], index: 6, kind: output, shape index: {}]  }
   0x1   :  { %12 = vsyncpa [#allocation6], 0 }
   0x2   :  { %13 = vsyncpa [#allocation4], 0  ;;  %s5182_s21 = smov [#allocation2]   ;;  %s5110_s25 = scalar_lea.hbm %s5603_s3, 32768 }
   0x3   :  { %s25_s22 = sshll.u32 %s5182_s21, 4  ;;  %p5111_p0 = scmp.ne.s32.totalorder %s5603_s3, %s5110_s25  ;;  %s26_s22 = int_to_ptr.vmem [resolvable:$true] %s25_s22 }
   0x4   :  { %p5114_p1 = scmp.lt.u32.totalorder %s5110_s25, %s5603_s3 }
   0x6   :  { %p5116_p2 = pnand %p5114_p1, %p5111_p0 }
   0x8   :  { %5119 = shalt.err (!%p5116_p2)
}
   0x9   :  { %s5120_s30 = scalar_lea.vmem %s26_s22, 32768  ;;  %p5125_p4 = scmp.lt.s32.totalorder %s26_s22, %s26_s22 }
   0xa   :  { %p5121_p3 = scmp.ne.s32.totalorder %s26_s22, %s5120_s30  ;;  %p5126_p5 = scmp.lt.s32.totalorder %s5120_s30, %s5120_s30 }
   0xc   :  { %p5127_p6 = por %p5126_p5, %p5125_p4 }
   0xe   :  { %p5128_p7 = pnand %p5127_p6, %p5121_p3 }
  0x10   :  { %5131 = shalt.err (!%p5128_p7)
}
  0x11   :  { %s5183_s7 = smov 2048   ;;  %s5184_s8 = smov 128  }
  0x12   :  { %31 = dma.hbm_to_vmem [thread:$0]  %s5603_s3, 32768, %s26_s22, [#allocation3], %s5183_s7, %s5183_s7, %s5184_s8  }
  0x13   :  { %s5185_s11 = smov [#allocation5]   ;;  %s5132_s15 = scalar_lea.hbm %s5604_s4, 16384 }
  0x14   :  { %s37_s12 = sshll.u32 %s5185_s11, 4  ;;  %p5133_p8 = scmp.ne.s32.totalorder %s5604_s4, %s5132_s15  ;;  %s38_s12 = int_to_ptr.vmem [resolvable:$true] %s37_s12 }
  0x15   :  { %p5136_p9 = scmp.lt.u32.totalorder %s5132_s15, %s5604_s4 }
  0x17   :  { %p5138_p10 = pnand %p5136_p9, %p5133_p8 }
  0x19   :  { %5141 = shalt.err (!%p5138_p10)
}
  0x1a   :  { %s5142_s20 = scalar_lea.vmem %s38_s12, 16384  ;;  %p5147_p12 = scmp.lt.s32.totalorder %s38_s12, %s38_s12 }
  0x1b   :  { %p5143_p11 = scmp.ne.s32.totalorder %s38_s12, %s5142_s20  ;;  %p5148_p13 = scmp.lt.s32.totalorder %s5142_s20, %s5142_s20 }
  0x1d   :  { %p5149_p0 = por %p5148_p13, %p5147_p12 }
  0x1f   :  { %p5150_p1 = pnand %p5149_p0, %p5143_p11 }
  0x21   :  { %5153 = shalt.err (!%p5150_p1)
}
  0x22   :  { %s5186_s3 = smov 64   ;;  %s5187_s21 = smov 4  }
  0x23   :  { %43 = dma.hbm_to_vmem [thread:$0]  %s5604_s4, 16384, %s38_s12, [#allocation6], %s5186_s3, %s5186_s3, %s5187_s21  }
  0x24   :  { %5176 = dma.done.wait [#allocation3], 32768  }
  0x25   :  { %5177 = vsyncadd [#allocation3], 4294934528 }
  0x26   :  { %5178 = dma.done.wait [#allocation6], 16384  }
  0x27   :  { %5179 = vsyncadd [#allocation6], 4294950912  ;;  %v5188_v0 = vmov 0   ;;  %v55_v1 = vld [vmem:[#allocation2] sm:$0xff]  ;;  %v56_v11 = vld [vmem:[#allocation2 + $0x8] sm:$0xff] }
  0x28   :  { %1797 = vmatprep.mubr.bf16.mxu0 %v5188_v0  ;;  %1840 = vmatprep.mubr.bf16.mxu1 %v5188_v0  ;;  %v71_v2 = vld [vmem:[#allocation2 + $0x80] sm:$0xff]  ;;  %v72_v15 = vld [vmem:[#allocation2 + $0x88] sm:$0xff]  ;;  %v57_v58 = vld [vmem:[#allocation2 + $0x10] sm:$0xff] }
  0x29   :  { %4850 = vset.pattern.permute.xlu0 %v5188_v0  ;;  %4851 = vset.pattern.permute.xlu1 %v5188_v0  ;;  %v87_v3 = vld [vmem:[#allocation2 + $0x100] sm:$0xff]  ;;  %v4236_v4 = vcombine.high %v55_v1, %v71_v2  ;;  %v4235_v5 = vcombine.low %v55_v1, %v71_v2  ;;  %v4238_v16 = vcombine.high %v56_v11, %v72_v15  ;;  %v88_v18 = vld [vmem:[#allocation2 + $0x108] sm:$0xff]  ;;  %v73_v59 = vld [vmem:[#allocation2 + $0x90] sm:$0xff] }
  0x2a   :  { %v103_v6 = vld [vmem:[#allocation2 + $0x180] sm:$0xff]  ;;  %v4237_v17 = vcombine.low %v56_v11, %v72_v15  ;;  %v104_v19 = vld [vmem:[#allocation2 + $0x188] sm:$0xff]  ;;  %v4240_v1 = vcombine.high %v57_v58, %v73_v59  ;;  %v90_v15 = vld [vmem:[#allocation2 + $0x118] sm:$0xff] }
  0x2b   :  { %v4268_v7 = vcombine.high %v87_v3, %v103_v6  ;;  %v119_v8 = vld [vmem:[#allocation2 + $0x200] sm:$0xff]  ;;  %1765 = vmatprep.subr.bf16.mxu0 %v4236_v4  ;;  %v4267_v10 = vcombine.low %v87_v3, %v103_v6  ;;  %v4270_v20 = vcombine.high %v88_v18, %v104_v19  ;;  %1808 = vmatprep.subr.bf16.mxu1 %v4238_v16  ;;  %v120_v22 = vld [vmem:[#allocation2 + $0x208] sm:$0xff]  ;;  %v89_v3 = vld [vmem:[#allocation2 + $0x110] sm:$0xff] }
  0x2c   :  { %v135_v9 = vld [vmem:[#allocation2 + $0x280] sm:$0xff]  ;;  %1766 = vmatpush1.bf16.msra.mxu0 %v4235_v5  ;;  %v136_v23 = vld [vmem:[#allocation2 + $0x288] sm:$0xff]  ;;  %1809 = vmatpush1.bf16.msra.mxu1 %v4237_v17  ;;  %v4269_v25 = vcombine.low %v88_v18, %v104_v19  ;;  %v105_v4 = vld [vmem:[#allocation2 + $0x190] sm:$0xff] }
  0x2d   :  { %1767 = vmatprep.subr.bf16.mxu0 %v4268_v7  ;;  %v4300_v12 = vcombine.high %v119_v8, %v135_v9  ;;  %v151_v13 = vld [vmem:[#allocation2 + $0x300] sm:$0xff]  ;;  %v4299_v21 = vcombine.low %v119_v8, %v135_v9  ;;  %1810 = vmatprep.subr.bf16.mxu1 %v4270_v20  ;;  %v4302_v28 = vcombine.high %v120_v22, %v136_v23  ;;  %v152_v29 = vld [vmem:[#allocation2 + $0x308] sm:$0xff]  ;;  %v58_v7 = vld [vmem:[#allocation2 + $0x18] sm:$0xff] }
  0x2e   :  { %v167_v14 = vld [vmem:[#allocation2 + $0x380] sm:$0xff]  ;;  %v168_v30 = vld [vmem:[#allocation2 + $0x388] sm:$0xff]  ;;  %v4301_v33 = vcombine.low %v120_v22, %v136_v23  ;;  %v74_v8 = vld [vmem:[#allocation2 + $0x98] sm:$0xff]  ;;  %v4239_v9 = vcombine.low %v57_v58, %v73_v59  ;;  %v4271_v17 = vcombine.low %v89_v3, %v105_v4 }
  0x2f   :  { %v4332_v24 = vcombine.high %v151_v13, %v167_v14  ;;  %v183_v26 = vld [vmem:[#allocation2 + $0x400] sm:$0xff]  ;;  %v4331_v31 = vcombine.low %v151_v13, %v167_v14  ;;  %v4334_v36 = vcombine.high %v152_v29, %v168_v30  ;;  %v184_v37 = vld [vmem:[#allocation2 + $0x408] sm:$0xff]  ;;  %v4333_v41 = vcombine.low %v152_v29, %v168_v30  ;;  %v137_v13 = vld [vmem:[#allocation2 + $0x290] sm:$0xff] }
  0x30   :  { %1768 = vmatpush1.bf16.msra.mxu0 %v4267_v10  ;;  %v199_v27 = vld [vmem:[#allocation2 + $0x480] sm:$0xff]  ;;  %1811 = vmatpush1.bf16.msra.mxu1 %v4269_v25  ;;  %v200_v38 = vld [vmem:[#allocation2 + $0x488] sm:$0xff]  ;;  %v4272_v10 = vcombine.high %v89_v3, %v105_v4  ;;  %v4242_v14 = vcombine.high %v58_v7, %v74_v8  ;;  %v106_v16 = vld [vmem:[#allocation2 + $0x198] sm:$0xff]  ;;  %v4241_v19 = vcombine.low %v58_v7, %v74_v8 }
  0x31   :  { %1769 = vmatprep.subr.bf16.mxu0 %v4300_v12  ;;  %v4364_v32 = vcombine.high %v183_v26, %v199_v27  ;;  %v215_v34 = vld [vmem:[#allocation2 + $0x500] sm:$0xff]  ;;  %1812 = vmatprep.subr.bf16.mxu1 %v4302_v28  ;;  %v4363_v39 = vcombine.low %v183_v26, %v199_v27  ;;  %v4366_v44 = vcombine.high %v184_v37, %v200_v38  ;;  %v216_v45 = vld [vmem:[#allocation2 + $0x508] sm:$0xff]  ;;  %v121_v12 = vld [vmem:[#allocation2 + $0x210] sm:$0xff] }
  0x32   :  { %v231_v35 = vld [vmem:[#allocation2 + $0x580] sm:$0xff]  ;;  %v232_v46 = vld [vmem:[#allocation2 + $0x588] sm:$0xff]  ;;  %v4365_v49 = vcombine.low %v184_v37, %v200_v38  ;;  %v4304_v18 = vcombine.high %v121_v12, %v137_v13  ;;  %v153_v20 = vld [vmem:[#allocation2 + $0x310] sm:$0xff]  ;;  %v4274_v22 = vcombine.high %v90_v15, %v106_v16  ;;  %v4303_v25 = vcombine.low %v121_v12, %v137_v13 }
  0x33   :  { %v4396_v40 = vcombine.high %v215_v34, %v231_v35  ;;  %v247_v42 = vld [vmem:[#allocation2 + $0x600] sm:$0xff]  ;;  %v4395_v47 = vcombine.low %v215_v34, %v231_v35  ;;  %v4398_v52 = vcombine.high %v216_v45, %v232_v46  ;;  %v248_v53 = vld [vmem:[#allocation2 + $0x608] sm:$0xff]  ;;  %v4397_v57 = vcombine.low %v216_v45, %v232_v46  ;;  %v122_v23 = vld [vmem:[#allocation2 + $0x218] sm:$0xff] }
  0x34   :  { %1770 = vmatpush1.bf16.msra.mxu0 %v4299_v21  ;;  %1813 = vmatpush1.bf16.msra.mxu1 %v4301_v33  ;;  %v263_v43 = vld [vmem:[#allocation2 + $0x680] sm:$0xff]  ;;  %v264_v54 = vld [vmem:[#allocation2 + $0x688] sm:$0xff]  ;;  %v169_v21 = vld [vmem:[#allocation2 + $0x390] sm:$0xff]  ;;  %v4273_v27 = vcombine.low %v90_v15, %v106_v16 }
  0x35   :  { %1771 = vmatprep.subr.bf16.mxu0 %v4332_v24  ;;  %1814 = vmatprep.subr.bf16.mxu1 %v4334_v36  ;;  %v4428_v48 = vcombine.high %v247_v42, %v263_v43  ;;  %v279_v50 = vld [vmem:[#allocation2 + $0x700] sm:$0xff]  ;;  %v4427_v55 = vcombine.low %v247_v42, %v263_v43  ;;  %v4430_v60 = vcombine.high %v248_v53, %v264_v54  ;;  %v280_v61 = vld [vmem:[#allocation2 + $0x708] sm:$0xff]  ;;  %v138_v24 = vld [vmem:[#allocation2 + $0x298] sm:$0xff] }
  0x36   :  { %v295_v51 = vld [vmem:[#allocation2 + $0x780] sm:$0xff]  ;;  %v296_v62 = vld [vmem:[#allocation2 + $0x788] sm:$0xff]  ;;  %v4429_v2 = vcombine.low %v248_v53, %v264_v54  ;;  %v4336_v26 = vcombine.high %v153_v20, %v169_v21  ;;  %v185_v28 = vld [vmem:[#allocation2 + $0x410] sm:$0xff]  ;;  %v4306_v30 = vcombine.high %v122_v23, %v138_v24  ;;  %v4335_v33 = vcombine.low %v153_v20, %v169_v21 }
  0x37   :  { %v4460_v56 = vcombine.high %v279_v50, %v295_v51  ;;  %v4459_v63 = vcombine.low %v279_v50, %v295_v51  ;;  %v4462_v5 = vcombine.high %v280_v61, %v296_v62  ;;  %v5258_v6 = vld [vmem:[%s5600_s0] sm:$0xff]   ;;  %v4461_v11 = vcombine.low %v280_v61, %v296_v62  ;;  %v201_v29 = vld [vmem:[#allocation2 + $0x490] sm:$0xff]  ;;  %v2486_v43 = vld [vmem:[%s5601_s1 + $0x8] sm:$0xff] }
  0x38   :  { %1772 = vmatpush1.bf16.msra.mxu0 %v4331_v31  ;;  %1815 = vmatpush1.bf16.msra.mxu1 %v4333_v41  ;;  %v154_v31 = vld [vmem:[#allocation2 + $0x318] sm:$0xff]  ;;  %v4368_v34 = vcombine.high %v185_v28, %v201_v29  ;;  %v4305_v35 = vcombine.low %v122_v23, %v138_v24  ;;  %v217_v36 = vld [vmem:[#allocation2 + $0x510] sm:$0xff]  ;;  %v4367_v42 = vcombine.low %v185_v28, %v201_v29  ;;  %v60_v12 = vld [vmem:[#allocation2 + $0x28] sm:$0xff] }
  0x39   :  { %1773 = vmatprep.subr.bf16.mxu0 %v4364_v32  ;;  %1816 = vmatprep.subr.bf16.mxu1 %v4366_v44  ;;  %v170_v32 = vld [vmem:[#allocation2 + $0x398] sm:$0xff]  ;;  %v233_v37 = vld [vmem:[#allocation2 + $0x590] sm:$0xff]  ;;  %v123_v16 = vld [vmem:[#allocation2 + $0x220] sm:$0xff] }
  0x3a   :  { %v4338_v38 = vcombine.high %v154_v31, %v170_v32  ;;  %v202_v41 = vld [vmem:[#allocation2 + $0x498] sm:$0xff]  ;;  %v4400_v44 = vcombine.high %v217_v36, %v233_v37  ;;  %v4337_v45 = vcombine.low %v154_v31, %v170_v32  ;;  %v249_v46 = vld [vmem:[#allocation2 + $0x610] sm:$0xff]  ;;  %v4399_v51 = vcombine.low %v217_v36, %v233_v37  ;;  %v92_v20 = vld [vmem:[#allocation2 + $0x128] sm:$0xff] }
  0x3b   :  { %v234_v50 = vld [vmem:[#allocation2 + $0x598] sm:$0xff]  ;;  %v281_v54 = vld [vmem:[#allocation2 + $0x710] sm:$0xff]  ;;  %v108_v21 = vld [vmem:[#allocation2 + $0x1a8] sm:$0xff] }
  0x3c   :  { %1774 = vmatpush1.bf16.msra.mxu0 %v4363_v39  ;;  %1817 = vmatpush1.bf16.msra.mxu1 %v4365_v49  ;;  %v2485_v39 = vld [vmem:[%s5601_s1] sm:$0xff]  ;;  %v218_v49 = vld [vmem:[#allocation2 + $0x518] sm:$0xff]  ;;  %v4499_v62 = vld [vmem:[%s5601_s1 + $0x10] sm:$0xff] }
  0x3d   :  { %1775 = vmatprep.subr.bf16.mxu0 %v4396_v40  ;;  %1818 = vmatprep.subr.bf16.mxu1 %v4398_v52  ;;  %v186_v40 = vld [vmem:[#allocation2 + $0x418] sm:$0xff]  ;;  %v4401_v61 = vcombine.low %v218_v49, %v234_v50  ;;  %v155_v24 = vld [vmem:[#allocation2 + $0x320] sm:$0xff]  ;;  %v124_v28 = vld [vmem:[#allocation2 + $0x228] sm:$0xff] }
  0x3e   :  { %2489 = vperm.xlu0 %4850, %v2485_v39   ;;  %v4369_v53 = vcombine.low %v186_v40, %v202_v41  ;;  %v266_v58 = vld [vmem:[#allocation2 + $0x698] sm:$0xff]  ;;  %2540 = vperm.xlu1 %4851, %v4499_v62   ;;  %v140_v29 = vld [vmem:[#allocation2 + $0x2a8] sm:$0xff]  ;;  %v187_v32 = vld [vmem:[#allocation2 + $0x420] sm:$0xff] }
  0x3f   :  { %v282_v3 = vld [vmem:[#allocation2 + $0x718] sm:$0xff]  ;;  %v156_v36 = vld [vmem:[#allocation2 + $0x328] sm:$0xff] }
  0x40   :  { %1776 = vmatpush1.bf16.msra.mxu0 %v4395_v47  ;;  %1819 = vmatpush1.bf16.msra.mxu1 %v4397_v57  ;;  %v265_v47 = vld [vmem:[#allocation2 + $0x690] sm:$0xff]  ;;  %v250_v57 = vld [vmem:[#allocation2 + $0x618] sm:$0xff]  ;;  %v172_v37 = vld [vmem:[#allocation2 + $0x3a8] sm:$0xff] }
  0x41   :  { %1777 = vmatprep.subr.bf16.mxu0 %v4428_v48  ;;  %1820 = vmatprep.subr.bf16.mxu1 %v4430_v60  ;;  %v4370_v48 = vcombine.high %v186_v40, %v202_v41  ;;  %v4432_v52 = vcombine.high %v249_v46, %v265_v47  ;;  %v4431_v59 = vcombine.low %v249_v46, %v265_v47  ;;  %v298_v4 = vld [vmem:[#allocation2 + $0x798] sm:$0xff]  ;;  %v219_v40 = vld [vmem:[#allocation2 + $0x520] sm:$0xff]  ;;  %v268_v62 = vld [vmem:[#allocation2 + $0x6a8] sm:$0xff] }
  0x42   :  { %2494 = vperm.xlu0 %4850, %v2486_v43   ;;  %v4466_v13 = vcombine.high %v282_v3, %v298_v4  ;;  %v235_v41 = vld [vmem:[#allocation2 + $0x5a0] sm:$0xff]  ;;  %v4309_v43 = vcombine.low %v124_v28, %v140_v29  ;;  %v4342_v46 = vcombine.high %v156_v36, %v172_v37 }
  0x44   :  { %1778 = vmatpush1.bf16.msra.mxu0 %v4427_v55  ;;  %1821 = vmatpush1.bf16.msra.mxu1 %v4429_v2  ;;  %v297_v55 = vld [vmem:[#allocation2 + $0x790] sm:$0xff]  ;;  %v4434_v2 = vcombine.high %v250_v57, %v266_v58 }
  0x45   :  { %1779 = vmatprep.subr.bf16.mxu0 %v4460_v56  ;;  %1822 = vmatprep.subr.bf16.mxu1 %v4462_v5  ;;  %v4402_v56 = vcombine.high %v218_v49, %v234_v50  ;;  %v4464_v60 = vcombine.high %v281_v54, %v297_v55  ;;  %v4500_v5 = vld [vmem:[%s5601_s1 + $0x18] sm:$0xff]  ;;  %v4463_v7 = vcombine.low %v281_v54, %v297_v55  ;;  %v267_v49 = vld [vmem:[#allocation2 + $0x6a0] sm:$0xff] }
  0x46   :  { %2545 = vperm.xlu1 %4851, %v4500_v5   ;;  %v4404_v50 = vcombine.high %v219_v40, %v235_v41  ;;  %v4403_v55 = vcombine.low %v219_v40, %v235_v41  ;;  %v158_v40 = vld [vmem:[#allocation2 + $0x338] sm:$0xff] }
  0x47   :  { %v174_v41 = vld [vmem:[#allocation2 + $0x3b8] sm:$0xff] }
  0x48   :  { %1780 = vmatpush1.bf16.msra.mxu0 %v4459_v63  ;;  %1823 = vmatpush1.bf16.msra.mxu1 %v4461_v11  ;;  %v59_v63 = vld [vmem:[#allocation2 + $0x20] sm:$0xff]  ;;  %v4433_v11 = vcombine.low %v250_v57, %v266_v58 }
  0x49   :  { %1851 = vmatprep.subr.bf16.mxu0 %v4240_v1  ;;  %1894 = vmatprep.subr.bf16.mxu1 %v4242_v14  ;;  %v75_v1 = vld [vmem:[#allocation2 + $0xa0] sm:$0xff]  ;;  %v76_v14 = vld [vmem:[#allocation2 + $0xa8] sm:$0xff] }
  0x4a   :  { %v4244_v8 = vcombine.high %v59_v63, %v75_v1  ;;  %v4243_v15 = vcombine.low %v59_v63, %v75_v1  ;;  %v299_v57 = vld [vmem:[#allocation2 + $0x7a0] sm:$0xff] }
  0x4b   :  { %1798 = vmatmul.mubr.bf16.vlgmr.msra.gmra.mrb[0].mxu0 %v5258_v6  ;;  %1841 = vmatmul.mubr.bf16.vlgmr.msra.gmra.mrb[0].mxu1 %v5258_v6  ;;  %v4505_v58 = vld [vmem:[%s5601_s1 + $0x20] sm:$0xff] }
  0x4c   :  { %1852 = vmatpush1.bf16.msra.mxu0 %v4239_v9  ;;  %1883 = vmatprep.mubr.bf16.mxu0 %v5188_v0  ;;  %v91_v9 = vld [vmem:[#allocation2 + $0x120] sm:$0xff] }
  0x4d   :  { %1853 = vmatprep.subr.bf16.mxu0 %v4272_v10  ;;  %1895 = vmatpush1.bf16.msra.mxu1 %v4241_v19  ;;  %v107_v10 = vld [vmem:[#allocation2 + $0x1a0] sm:$0xff]  ;;  %v4465_v19 = vcombine.low %v282_v3, %v298_v4  ;;  %v77_v3 = vld [vmem:[#allocation2 + $0xb0] sm:$0xff]  ;;  %v4506_v4 = vld [vmem:[%s5601_s1 + $0x28] sm:$0xff] }
  0x4e   :  { %1896 = vmatprep.subr.bf16.mxu1 %v4274_v22  ;;  %1926 = vmatprep.mubr.bf16.mxu1 %v5188_v0  ;;  %v4246_v22 = vcombine.high %v60_v12, %v76_v14  ;;  %v4275_v23 = vcombine.low %v91_v9, %v107_v10 }
  0x4f   :  { %2591 = vperm.xlu0 %4850, %v4505_v58   ;;  %2596 = vperm.xlu1 %4851, %v4506_v4   ;;  %v238_v58 = vld [vmem:[#allocation2 + $0x5b8] sm:$0xff]  ;;  %v4511_v4 = vld [vmem:[%s5601_s1 + $0x30] sm:$0xff] }
  0x50   :  { %1854 = vmatpush1.bf16.msra.mxu0 %v4271_v17  ;;  %v139_v17 = vld [vmem:[#allocation2 + $0x2a0] sm:$0xff] }
  0x51   :  { %1855 = vmatprep.subr.bf16.mxu0 %v4304_v18  ;;  %1897 = vmatpush1.bf16.msra.mxu1 %v4273_v27  ;;  %v4276_v18 = vcombine.high %v91_v9, %v107_v10  ;;  %v4245_v27 = vcombine.low %v60_v12, %v76_v14  ;;  %v4307_v31 = vcombine.low %v123_v16, %v139_v17  ;;  %v300_v9 = vld [vmem:[#allocation2 + $0x7a8] sm:$0xff]  ;;  %v93_v12 = vld [vmem:[#allocation2 + $0x130] sm:$0xff] }
  0x52   :  { %1898 = vmatprep.subr.bf16.mxu1 %v4306_v30  ;;  %v4278_v30 = vcombine.high %v92_v20, %v108_v21 }
  0x53   :  { %2642 = vperm.xlu0 %4850, %v4511_v4   ;;  %v240_v4 = vld [vmem:[#allocation2 + $0x5c8] sm:$0xff] }
  0x54   :  { %1856 = vmatpush1.bf16.msra.mxu0 %v4303_v25  ;;  %v171_v25 = vld [vmem:[#allocation2 + $0x3a0] sm:$0xff] }
  0x55   :  { %1857 = vmatprep.subr.bf16.mxu0 %v4336_v26  ;;  %1899 = vmatpush1.bf16.msra.mxu1 %v4305_v35  ;;  %v4308_v26 = vcombine.high %v123_v16, %v139_v17  ;;  %v4277_v35 = vcombine.low %v92_v20, %v108_v21  ;;  %v4339_v39 = vcombine.low %v155_v24, %v171_v25  ;;  %v62_v16 = vld [vmem:[#allocation2 + $0x38] sm:$0xff]  ;;  %v125_v20 = vld [vmem:[#allocation2 + $0x230] sm:$0xff] }
  0x56   :  { %1900 = vmatprep.subr.bf16.mxu1 %v4338_v38  ;;  %v4310_v38 = vcombine.high %v124_v28, %v140_v29  ;;  %v78_v17 = vld [vmem:[#allocation2 + $0xb8] sm:$0xff]  ;;  %v141_v21 = vld [vmem:[#allocation2 + $0x2b0] sm:$0xff] }
  0x57   :  { %v157_v28 = vld [vmem:[#allocation2 + $0x330] sm:$0xff] }
  0x58   :  { %1858 = vmatpush1.bf16.msra.mxu0 %v4335_v33  ;;  %v203_v33 = vld [vmem:[#allocation2 + $0x4a0] sm:$0xff]  ;;  %v173_v29 = vld [vmem:[#allocation2 + $0x3b0] sm:$0xff] }
  0x59   :  { %1859 = vmatprep.subr.bf16.mxu0 %v4368_v34  ;;  %1901 = vmatpush1.bf16.msra.mxu1 %v4337_v45  ;;  %v4340_v34 = vcombine.high %v155_v24, %v171_v25  ;;  %v204_v45 = vld [vmem:[#allocation2 + $0x4a8] sm:$0xff]  ;;  %v4371_v47 = vcombine.low %v187_v32, %v203_v33  ;;  %v94_v24 = vld [vmem:[#allocation2 + $0x138] sm:$0xff] }
  0x5a   :  { %1902 = vmatprep.subr.bf16.mxu1 %v4370_v48  ;;  %v251_v48 = vld [vmem:[#allocation2 + $0x620] sm:$0xff]  ;;  %v110_v25 = vld [vmem:[#allocation2 + $0x1b8] sm:$0xff] }
  0x5b   :  { %v4435_v1 = vcombine.low %v251_v48, %v267_v49 }
  0x5c   :  { %1860 = vmatpush1.bf16.msra.mxu0 %v4367_v42  ;;  %v4372_v42 = vcombine.high %v187_v32, %v203_v33  ;;  %v126_v32 = vld [vmem:[#allocation2 + $0x238] sm:$0xff] }
  0x5d   :  { %1861 = vmatprep.subr.bf16.mxu0 %v4400_v44  ;;  %1903 = vmatpush1.bf16.msra.mxu1 %v4369_v53  ;;  %v188_v44 = vld [vmem:[#allocation2 + $0x428] sm:$0xff]  ;;  %v142_v33 = vld [vmem:[#allocation2 + $0x2b8] sm:$0xff] }
  0x5e   :  { %1904 = vmatprep.subr.bf16.mxu1 %v4402_v56  ;;  %v236_v53 = vld [vmem:[#allocation2 + $0x5a8] sm:$0xff]  ;;  %v4374_v54 = vcombine.high %v188_v44, %v204_v45  ;;  %v283_v56 = vld [vmem:[#allocation2 + $0x720] sm:$0xff] }
  0x5f   :  { %v4468_v5 = vcombine.high %v283_v56, %v299_v57 }
  0x60   :  { %1862 = vmatpush1.bf16.msra.mxu0 %v4399_v51  ;;  %v4341_v51 = vcombine.low %v156_v36, %v172_v37  ;;  %v189_v36 = vld [vmem:[#allocation2 + $0x430] sm:$0xff] }
  0x61   :  { %1863 = vmatprep.subr.bf16.mxu0 %v4432_v52  ;;  %1905 = vmatpush1.bf16.msra.mxu1 %v4401_v61  ;;  %v220_v52 = vld [vmem:[#allocation2 + $0x528] sm:$0xff]  ;;  %v205_v37 = vld [vmem:[#allocation2 + $0x4b0] sm:$0xff] }
  0x62   :  { %1906 = vmatprep.subr.bf16.mxu1 %v4434_v2  ;;  %v252_v61 = vld [vmem:[#allocation2 + $0x628] sm:$0xff]  ;;  %v4406_v63 = vcombine.high %v220_v52, %v236_v53  ;;  %v61_v2 = vld [vmem:[#allocation2 + $0x30] sm:$0xff] }
  0x63   :  { %v4438_v10 = vcombine.high %v252_v61, %v268_v62  ;;  %v4248_v14 = vcombine.high %v61_v2, %v77_v3 }
  0x64   :  { %1864 = vmatpush1.bf16.msra.mxu0 %v4431_v59  ;;  %v4436_v59 = vcombine.high %v251_v48, %v267_v49  ;;  %v190_v48 = vld [vmem:[#allocation2 + $0x438] sm:$0xff] }
  0x65   :  { %1865 = vmatprep.subr.bf16.mxu0 %v4464_v60  ;;  %1907 = vmatpush1.bf16.msra.mxu1 %v4433_v11  ;;  %v4373_v60 = vcombine.low %v188_v44, %v204_v45  ;;  %v4467_v11 = vcombine.low %v283_v56, %v299_v57  ;;  %v221_v44 = vld [vmem:[#allocation2 + $0x530] sm:$0xff]  ;;  %v206_v49 = vld [vmem:[#allocation2 + $0x4b8] sm:$0xff] }
  0x66   :  { %1908 = vmatprep.subr.bf16.mxu1 %v4466_v13  ;;  %v109_v13 = vld [vmem:[#allocation2 + $0x1b0] sm:$0xff]  ;;  %v222_v56 = vld [vmem:[#allocation2 + $0x538] sm:$0xff]  ;;  %v4378_v57 = vcombine.high %v190_v48, %v206_v49 }
  0x67   :  { %v237_v45 = vld [vmem:[#allocation2 + $0x5b0] sm:$0xff] }
  0x68   :  { %1866 = vmatpush1.bf16.msra.mxu0 %v4463_v7  ;;  %v4405_v7 = vcombine.low %v220_v52, %v236_v53  ;;  %v253_v52 = vld [vmem:[#allocation2 + $0x630] sm:$0xff]  ;;  %v4408_v53 = vcombine.high %v221_v44, %v237_v45 }
  0x69   :  { %1937 = vmatprep.subr.bf16.mxu0 %v4244_v8  ;;  %1909 = vmatpush1.bf16.msra.mxu1 %v4465_v19  ;;  %v284_v8 = vld [vmem:[#allocation2 + $0x728] sm:$0xff]  ;;  %v4247_v19 = vcombine.low %v61_v2, %v77_v3  ;;  %v270_v2 = vld [vmem:[#allocation2 + $0x6b8] sm:$0xff]  ;;  %v4410_v3 = vcombine.high %v222_v56, %v238_v58 }
  0x6a   :  { %1980 = vmatprep.subr.bf16.mxu1 %v4246_v22  ;;  %v4280_v22 = vcombine.high %v93_v12, %v109_v13 }
  0x6b   :  { %1884 = vmatmul.mubr.bf16.vlgmr.msra.gmra.mrb[4].mxu0 %v5258_v6 }
  0x6c   :  { %1938 = vmatpush1.bf16.msra.mxu0 %v4243_v15  ;;  %1969 = vmatprep.mubr.bf16.mxu0 %v5188_v0  ;;  %v4437_v15 = vcombine.low %v252_v61, %v268_v62  ;;  %v301_v61 = vld [vmem:[#allocation2 + $0x7b0] sm:$0xff] }
  0x6d   :  { %1939 = vmatprep.subr.bf16.mxu0 %v4276_v18  ;;  %1927 = vmatmul.mubr.bf16.vlgmr.msra.gmra.mrb[4].mxu1 %v5258_v6  ;;  %v4470_v18 = vcombine.high %v284_v8, %v300_v9 }
  0x6e   :  { %1981 = vmatpush1.bf16.msra.mxu1 %v4245_v27  ;;  %2012 = vmatprep.mubr.bf16.mxu1 %v5188_v0  ;;  %v4279_v27 = vcombine.low %v93_v12, %v109_v13  ;;  %v286_v12 = vld [vmem:[#allocation2 + $0x738] sm:$0xff] }
  0x6f   :  { %1982 = vmatprep.subr.bf16.mxu1 %v4278_v30  ;;  %v4312_v30 = vcombine.high %v125_v20, %v141_v21  ;;  %v302_v13 = vld [vmem:[#allocation2 + $0x7b8] sm:$0xff] }
  0x70   :  { %1940 = vmatpush1.bf16.msra.mxu0 %v4275_v23  ;;  %v4469_v23 = vcombine.low %v284_v8, %v300_v9  ;;  %v79_v8 = vld [vmem:[#allocation2 + $0xc0] sm:$0xff]  ;;  %v4512_v9 = vld [vmem:[%s5601_s1 + $0x38] sm:$0xff] }
  0x71   :  { %1941 = vmatprep.subr.bf16.mxu0 %v4308_v26  ;;  %v4250_v26 = vcombine.high %v62_v16, %v78_v17  ;;  %2647 = vperm.xlu1 %4851, %v4512_v9   ;;  %v287_v9 = vld [vmem:[#allocation2 + $0x740] sm:$0xff] }
  0x72   :  { %1983 = vmatpush1.bf16.msra.mxu1 %v4277_v35  ;;  %v4311_v35 = vcombine.low %v125_v20, %v141_v21  ;;  %v64_v20 = vld [vmem:[#allocation2 + $0x48] sm:$0xff] }
  0x73   :  { %1984 = vmatprep.subr.bf16.mxu1 %v4310_v38  ;;  %v4344_v38 = vcombine.high %v157_v28, %v173_v29  ;;  %v80_v21 = vld [vmem:[#allocation2 + $0xc8] sm:$0xff] }
  0x74   :  { %1942 = vmatpush1.bf16.msra.mxu0 %v4307_v31  ;;  %v4249_v31 = vcombine.low %v62_v16, %v78_v17  ;;  %v95_v16 = vld [vmem:[#allocation2 + $0x140] sm:$0xff] }
  0x75   :  { %1943 = vmatprep.subr.bf16.mxu0 %v4340_v34  ;;  %v4282_v34 = vcombine.high %v94_v24, %v110_v25  ;;  %v111_v17 = vld [vmem:[#allocation2 + $0x1c0] sm:$0xff] }
  0x76   :  { %1985 = vmatpush1.bf16.msra.mxu1 %v4309_v43  ;;  %v4343_v43 = vcombine.low %v157_v28, %v173_v29  ;;  %v96_v28 = vld [vmem:[#allocation2 + $0x148] sm:$0xff]  ;;  %v4254_v29 = vcombine.high %v64_v20, %v80_v21 }
  0x77   :  { %1986 = vmatprep.subr.bf16.mxu1 %v4342_v46  ;;  %v4376_v46 = vcombine.high %v189_v36, %v205_v37 }
  0x78   :  { %1944 = vmatpush1.bf16.msra.mxu0 %v4339_v39  ;;  %v4281_v39 = vcombine.low %v94_v24, %v110_v25  ;;  %v4284_v24 = vcombine.high %v95_v16, %v111_v17  ;;  %v127_v25 = vld [vmem:[#allocation2 + $0x240] sm:$0xff] }
  0x79   :  { %1945 = vmatprep.subr.bf16.mxu0 %v4372_v42  ;;  %v4314_v42 = vcombine.high %v126_v32, %v142_v33 }
  0x7a   :  { %1987 = vmatpush1.bf16.msra.mxu1 %v4341_v51  ;;  %v4375_v51 = vcombine.low %v189_v36, %v205_v37  ;;  %v128_v36 = vld [vmem:[#allocation2 + $0x248] sm:$0xff] }
  0x7b   :  { %1988 = vmatprep.subr.bf16.mxu1 %v4374_v54  ;;  %v269_v54 = vld [vmem:[#allocation2 + $0x6b0] sm:$0xff] }
  0x7c   :  { %1946 = vmatpush1.bf16.msra.mxu0 %v4371_v47  ;;  %v4313_v47 = vcombine.low %v126_v32, %v142_v33  ;;  %v4440_v62 = vcombine.high %v253_v52, %v269_v54  ;;  %v159_v33 = vld [vmem:[#allocation2 + $0x340] sm:$0xff] }
  0x7d   :  { %1947 = vmatprep.subr.bf16.mxu0 %v4404_v50  ;;  %v4346_v50 = vcombine.high %v158_v40, %v174_v41 }
  0x7e   :  { %1989 = vmatpush1.bf16.msra.mxu1 %v4373_v60  ;;  %v285_v60 = vld [vmem:[#allocation2 + $0x730] sm:$0xff] }
  0x7f   :  { %1990 = vmatprep.subr.bf16.mxu1 %v4406_v63  ;;  %v4377_v63 = vcombine.low %v190_v48, %v206_v49  ;;  %v4523_v49 = vld [vmem:[%s5601_s1 + $0x50] sm:$0xff] }
  0x80   :  { %1948 = vmatpush1.bf16.msra.mxu0 %v4403_v55  ;;  %v4345_v55 = vcombine.low %v158_v40, %v174_v41  ;;  %v4517_v40 = vld [vmem:[%s5601_s1 + $0x40] sm:$0xff] }
  0x81   :  { %1949 = vmatprep.subr.bf16.mxu0 %v4436_v59  ;;  %v4407_v59 = vcombine.low %v221_v44, %v237_v45  ;;  %v160_v45 = vld [vmem:[#allocation2 + $0x348] sm:$0xff]  ;;  %2693 = vperm.xlu0 %4850, %v4517_v40   ;;  %v5327_v40 = vld [vmem:[%s5600_s0] sm:$0xff]  }
  0x82   :  { %1991 = vmatpush1.bf16.msra.mxu1 %v4405_v7  ;;  %v63_v7 = vld [vmem:[#allocation2 + $0x40] sm:$0xff] }
  0x83   :  { %1992 = vmatprep.subr.bf16.mxu1 %v4438_v10  ;;  %v4472_v10 = vcombine.high %v285_v60, %v301_v61 }
  0x84   :  { %1950 = vmatpush1.bf16.msra.mxu0 %v4435_v1  ;;  %v254_v1 = vld [vmem:[#allocation2 + $0x638] sm:$0xff] }
  0x85   :  { %1951 = vmatprep.subr.bf16.mxu0 %v4468_v5  ;;  %v4439_v5 = vcombine.low %v253_v52, %v269_v54  ;;  %v239_v52 = vld [vmem:[#allocation2 + $0x5c0] sm:$0xff]  ;;  %2744 = vperm.xlu0 %4850, %v4523_v49   ;;  %v193_v49 = vld [vmem:[#allocation2 + $0x450] sm:$0xff] }
  0x86   :  { %1993 = vmatpush1.bf16.msra.mxu1 %v4437_v15  ;;  %v4471_v15 = vcombine.low %v285_v60, %v301_v61  ;;  %v255_v61 = vld [vmem:[#allocation2 + $0x640] sm:$0xff] }
  0x87   :  { %1994 = vmatprep.subr.bf16.mxu1 %v4470_v18  ;;  %v4252_v18 = vcombine.high %v63_v7, %v79_v8 }
  0x88   :  { %1952 = vmatpush1.bf16.msra.mxu0 %v4467_v11  ;;  %v4409_v11 = vcombine.low %v222_v56, %v238_v58  ;;  %v4524_v56 = vld [vmem:[%s5601_s1 + $0x58] sm:$0xff] }
  0x89   :  { %2023 = vmatprep.subr.bf16.mxu0 %v4248_v14  ;;  %v4442_v14 = vcombine.high %v254_v1, %v270_v2 }
  0x8a   :  { %1995 = vmatpush1.bf16.msra.mxu1 %v4469_v23  ;;  %v4251_v23 = vcombine.low %v63_v7, %v79_v8  ;;  %v4535_v7 = vld [vmem:[%s5601_s1 + $0x70] sm:$0xff] }
  0x8b   :  { %1970 = vmatmul.mubr.bf16.vlgmr.msra.gmra.mrb[8].mxu0 %v5258_v6  ;;  %2066 = vmatprep.subr.bf16.mxu1 %v4250_v26  ;;  %v143_v26 = vld [vmem:[#allocation2 + $0x2c0] sm:$0xff] }
  0x8c   :  { %2024 = vmatpush1.bf16.msra.mxu0 %v4247_v19  ;;  %2055 = vmatprep.mubr.bf16.mxu0 %v5188_v0  ;;  %v4441_v19 = vcombine.low %v254_v1, %v270_v2  ;;  %v4316_v32 = vcombine.high %v127_v25, %v143_v26  ;;  %v224_v2 = vld [vmem:[#allocation2 + $0x548] sm:$0xff] }
  0x8d   :  { %2025 = vmatprep.subr.bf16.mxu0 %v4280_v22  ;;  %2013 = vmatmul.mubr.bf16.vlgmr.msra.gmra.mrb[8].mxu1 %v5258_v6  ;;  %v4474_v22 = vcombine.high %v286_v12, %v302_v13 }
  0x8e   :  { %2067 = vmatpush1.bf16.msra.mxu1 %v4249_v31  ;;  %2098 = vmatprep.mubr.bf16.mxu1 %v5188_v0  ;;  %v4283_v31 = vcombine.low %v95_v16, %v111_v17  ;;  %v65_v17 = vld [vmem:[#allocation2 + $0x50] sm:$0xff] }
  0x8f   :  { %2068 = vmatprep.subr.bf16.mxu1 %v4282_v34  ;;  %v175_v34 = vld [vmem:[#allocation2 + $0x3c0] sm:$0xff] }
  0x90   :  { %2026 = vmatpush1.bf16.msra.mxu0 %v4279_v27  ;;  %v4473_v27 = vcombine.low %v286_v12, %v302_v13  ;;  %v4348_v41 = vcombine.high %v159_v33, %v175_v34  ;;  %v4347_v48 = vcombine.low %v159_v33, %v175_v34  ;;  %v256_v12 = vld [vmem:[#allocation2 + $0x648] sm:$0xff]  ;;  %v4414_v13 = vcombine.high %v224_v2, %v240_v4  ;;  %v129_v33 = vld [vmem:[#allocation2 + $0x250] sm:$0xff] }
  0x91   :  { %2027 = vmatprep.subr.bf16.mxu0 %v4312_v30  ;;  %v112_v30 = vld [vmem:[#allocation2 + $0x1c8] sm:$0xff]  ;;  %v145_v34 = vld [vmem:[#allocation2 + $0x2d0] sm:$0xff] }
  0x92   :  { %2069 = vmatpush1.bf16.msra.mxu1 %v4281_v39  ;;  %v4286_v37 = vcombine.high %v96_v28, %v112_v30  ;;  %v4315_v39 = vcombine.low %v127_v25, %v143_v26  ;;  %v4285_v44 = vcombine.low %v96_v28, %v112_v30  ;;  %v97_v26 = vld [vmem:[#allocation2 + $0x150] sm:$0xff]  ;;  %v66_v30 = vld [vmem:[#allocation2 + $0x58] sm:$0xff] }
  0x93   :  { %2070 = vmatprep.subr.bf16.mxu1 %v4314_v42  ;;  %v191_v42 = vld [vmem:[#allocation2 + $0x440] sm:$0xff] }
  0x94   :  { %2028 = vmatpush1.bf16.msra.mxu0 %v4311_v35  ;;  %v4253_v35 = vcombine.low %v64_v20, %v80_v21  ;;  %v4413_v20 = vcombine.low %v224_v2, %v240_v4  ;;  %v288_v21 = vld [vmem:[#allocation2 + $0x748] sm:$0xff]  ;;  %v257_v2 = vld [vmem:[#allocation2 + $0x650] sm:$0xff] }
  0x95   :  { %2029 = vmatprep.subr.bf16.mxu0 %v4344_v38  ;;  %v144_v38 = vld [vmem:[#allocation2 + $0x2c8] sm:$0xff] }
  0x96   :  { %2071 = vmatpush1.bf16.msra.mxu1 %v4313_v47  ;;  %v176_v47 = vld [vmem:[#allocation2 + $0x3c8] sm:$0xff] }
  0x97   :  { %2072 = vmatprep.subr.bf16.mxu1 %v4346_v50  ;;  %v4350_v54 = vcombine.high %v160_v45, %v176_v47 }
  0x98   :  { %2030 = vmatpush1.bf16.msra.mxu0 %v4343_v43  ;;  %v207_v43 = vld [vmem:[#allocation2 + $0x4c0] sm:$0xff] }
  0x99   :  { %2031 = vmatprep.subr.bf16.mxu0 %v4376_v46  ;;  %v4318_v46 = vcombine.high %v128_v36, %v144_v38  ;;  %v4380_v50 = vcombine.high %v191_v42, %v207_v43  ;;  %v4379_v58 = vcombine.low %v191_v42, %v207_v43  ;;  %v161_v42 = vld [vmem:[#allocation2 + $0x350] sm:$0xff] }
  0x9a   :  { %2073 = vmatpush1.bf16.msra.mxu1 %v4345_v55  ;;  %v192_v55 = vld [vmem:[#allocation2 + $0x448] sm:$0xff]  ;;  %v177_v43 = vld [vmem:[#allocation2 + $0x3d0] sm:$0xff] }
  0x9b   :  { %2074 = vmatprep.subr.bf16.mxu1 %v4378_v57  ;;  %v208_v57 = vld [vmem:[#allocation2 + $0x4c8] sm:$0xff] }
  0x9c   :  { %2032 = vmatpush1.bf16.msra.mxu0 %v4375_v51  ;;  %v223_v51 = vld [vmem:[#allocation2 + $0x540] sm:$0xff]  ;;  %v4382_v1 = vcombine.high %v192_v55, %v208_v57 }
  0x9d   :  { %2033 = vmatprep.subr.bf16.mxu0 %v4408_v53  ;;  %v4317_v53 = vcombine.low %v128_v36, %v144_v38  ;;  %v4412_v60 = vcombine.high %v223_v51, %v239_v52 }
  0x9e   :  { %2075 = vmatpush1.bf16.msra.mxu1 %v4377_v63  ;;  %v4349_v63 = vcombine.low %v160_v45, %v176_v47 }
  0x9f   :  { %2076 = vmatprep.subr.bf16.mxu1 %v4410_v3  ;;  %v4530_v3 = vld [vmem:[%s5601_s1 + $0x68] sm:$0xff] }
  0xa0   :  { %2034 = vmatpush1.bf16.msra.mxu0 %v4407_v59  ;;  %v4529_v59 = vld [vmem:[%s5601_s1 + $0x60] sm:$0xff] }
  0xa1   :  { %2035 = vmatprep.subr.bf16.mxu0 %v4440_v62  ;;  %v271_v62 = vld [vmem:[#allocation2 + $0x6c0] sm:$0xff]  ;;  %2795 = vperm.xlu0 %4850, %v4529_v59   ;;  %v241_v59 = vld [vmem:[#allocation2 + $0x5d0] sm:$0xff] }
  0xa2   :  { %2077 = vmatpush1.bf16.msra.mxu1 %v4409_v11  ;;  %v4444_v8 = vcombine.high %v255_v61, %v271_v62  ;;  %v4381_v11 = vcombine.low %v192_v55, %v208_v57  ;;  %v4443_v16 = vcombine.low %v255_v61, %v271_v62  ;;  %v178_v55 = vld [vmem:[#allocation2 + $0x3d8] sm:$0xff]  ;;  %v225_v57 = vld [vmem:[#allocation2 + $0x550] sm:$0xff] }
  0xa3   :  { %2078 = vmatprep.subr.bf16.mxu1 %v4442_v14  ;;  %v272_v14 = vld [vmem:[#allocation2 + $0x6c8] sm:$0xff]  ;;  %v194_v62 = vld [vmem:[#allocation2 + $0x458] sm:$0xff]  ;;  %v4416_v4 = vcombine.high %v225_v57, %v241_v59 }
  0xa4   :  { %2036 = vmatpush1.bf16.msra.mxu0 %v4439_v5  ;;  %v4411_v5 = vcombine.low %v223_v51, %v239_v52  ;;  %v4445_v28 = vcombine.low %v256_v12, %v272_v14  ;;  %v4352_v51 = vcombine.high %v161_v42, %v177_v43 }
  0xa5   :  { %2037 = vmatprep.subr.bf16.mxu0 %v4472_v10  ;;  %v303_v10 = vld [vmem:[#allocation2 + $0x7c0] sm:$0xff]  ;;  %2846 = vperm.xlu0 %4850, %v4535_v7   ;;  %v226_v7 = vld [vmem:[#allocation2 + $0x558] sm:$0xff] }
  0xa6   :  { %2079 = vmatpush1.bf16.msra.mxu1 %v4441_v19  ;;  %v4476_v19 = vcombine.high %v287_v9, %v303_v10 }
  0xa7   :  { %2080 = vmatprep.subr.bf16.mxu1 %v4474_v22  ;;  %v4446_v22 = vcombine.high %v256_v12, %v272_v14  ;;  %v305_v12 = vld [vmem:[#allocation2 + $0x7d0] sm:$0xff] }
  0xa8   :  { %2038 = vmatpush1.bf16.msra.mxu0 %v4471_v15  ;;  %v4536_v15 = vld [vmem:[%s5601_s1 + $0x78] sm:$0xff] }
  0xa9   :  { %2109 = vmatprep.subr.bf16.mxu0 %v4252_v18  ;;  %v81_v18 = vld [vmem:[#allocation2 + $0xd0] sm:$0xff] }
  0xaa   :  { %2081 = vmatpush1.bf16.msra.mxu1 %v4473_v27  ;;  %v4256_v25 = vcombine.high %v65_v17, %v81_v18  ;;  %v113_v27 = vld [vmem:[#allocation2 + $0x1d0] sm:$0xff] }
  0xab   :  { %2056 = vmatmul.mubr.bf16.vlgmr.msra.gmra.mrb[12].mxu0 %v5258_v6  ;;  %2152 = vmatprep.subr.bf16.mxu1 %v4254_v29 }
  0xac   :  { %2110 = vmatpush1.bf16.msra.mxu0 %v4251_v23  ;;  %2141 = vmatprep.mubr.bf16.mxu0 %v5188_v0  ;;  %v304_v23 = vld [vmem:[#allocation2 + $0x7c8] sm:$0xff] }
  0xad   :  { %2111 = vmatprep.subr.bf16.mxu0 %v4284_v24  ;;  %2099 = vmatmul.mubr.bf16.vlgmr.msra.gmra.mrb[12].mxu1 %v5258_v6  ;;  %v4518_v6 = vld [vmem:[%s5601_s1 + $0x48] sm:$0xff]  ;;  %v4475_v24 = vcombine.low %v287_v9, %v303_v10  ;;  %v4478_v29 = vcombine.high %v288_v21, %v304_v23  ;;  %v4477_v36 = vcombine.low %v288_v21, %v304_v23  ;;  %v242_v9 = vld [vmem:[#allocation2 + $0x5d8] sm:$0xff] }
  0xae   :  { %2153 = vmatpush1.bf16.msra.mxu1 %v4253_v35  ;;  %2184 = vmatprep.mubr.bf16.mxu1 %v5188_v0  ;;  %v4288_v35 = vcombine.high %v97_v26, %v113_v27  ;;  %v4415_v10 = vcombine.low %v225_v57, %v241_v59  ;;  %v290_v23 = vld [vmem:[#allocation2 + $0x758] sm:$0xff]  ;;  %v180_v57 = vld [vmem:[#allocation2 + $0x3e8] sm:$0xff] }
  0xaf   :  { %2154 = vmatprep.subr.bf16.mxu1 %v4286_v37  ;;  %2698 = vperm.xlu1 %4851, %v4518_v6   ;;  %v98_v37 = vld [vmem:[#allocation2 + $0x158] sm:$0xff] }
  0xb0   :  { %2112 = vmatpush1.bf16.msra.mxu0 %v4283_v31  ;;  %v82_v31 = vld [vmem:[#allocation2 + $0xd8] sm:$0xff] }
  0xb1   :  { %2113 = vmatprep.subr.bf16.mxu0 %v4316_v32  ;;  %v4255_v32 = vcombine.low %v65_v17, %v81_v18  ;;  %v4258_v38 = vcombine.high %v66_v30, %v82_v31  ;;  %v4257_v45 = vcombine.low %v66_v30, %v82_v31  ;;  %v146_v6 = vld [vmem:[#allocation2 + $0x2d8] sm:$0xff]  ;;  %v115_v30 = vld [vmem:[#allocation2 + $0x1e0] sm:$0xff] }
  0xb2   :  { %2155 = vmatpush1.bf16.msra.mxu1 %v4285_v44  ;;  %v4320_v44 = vcombine.high %v129_v33, %v145_v34  ;;  %v274_v17 = vld [vmem:[#allocation2 + $0x6d8] sm:$0xff] }
  0xb3   :  { %2156 = vmatprep.subr.bf16.mxu1 %v4318_v46  ;;  %2749 = vperm.xlu1 %4851, %v4524_v56   ;;  %v130_v46 = vld [vmem:[#allocation2 + $0x258] sm:$0xff]  ;;  %v4351_v56 = vcombine.low %v161_v42, %v177_v43  ;;  %v116_v42 = vld [vmem:[#allocation2 + $0x1e8] sm:$0xff] }
  0xb4   :  { %2114 = vmatpush1.bf16.msra.mxu0 %v4315_v39  ;;  %v114_v39 = vld [vmem:[#allocation2 + $0x1d8] sm:$0xff] }
  0xb5   :  { %2115 = vmatprep.subr.bf16.mxu0 %v4348_v41  ;;  %v4287_v41 = vcombine.low %v97_v26, %v113_v27  ;;  %v4290_v47 = vcombine.high %v98_v37, %v114_v39  ;;  %v4289_v52 = vcombine.low %v98_v37, %v114_v39  ;;  %v131_v37 = vld [vmem:[#allocation2 + $0x260] sm:$0xff] }
  0xb6   :  { %2157 = vmatpush1.bf16.msra.mxu1 %v4317_v53  ;;  %v162_v53 = vld [vmem:[#allocation2 + $0x358] sm:$0xff] }
  0xb7   :  { %2158 = vmatprep.subr.bf16.mxu1 %v4350_v54  ;;  %2800 = vperm.xlu1 %4851, %v4530_v3   ;;  %v4322_v54 = vcombine.high %v130_v46, %v146_v6  ;;  %v4354_v61 = vcombine.high %v162_v53, %v178_v55  ;;  %v273_v3 = vld [vmem:[#allocation2 + $0x6d0] sm:$0xff] }
  0xb8   :  { %2116 = vmatpush1.bf16.msra.mxu0 %v4347_v48  ;;  %v4319_v48 = vcombine.low %v129_v33, %v145_v34  ;;  %v4447_v18 = vcombine.low %v257_v2, %v273_v3  ;;  %v84_v33 = vld [vmem:[#allocation2 + $0xe8] sm:$0xff] }
  0xb9   :  { %2117 = vmatprep.subr.bf16.mxu0 %v4380_v50  ;;  %v209_v50 = vld [vmem:[#allocation2 + $0x4d0] sm:$0xff] }
  0xba   :  { %2159 = vmatpush1.bf16.msra.mxu1 %v4349_v63  ;;  %v210_v63 = vld [vmem:[#allocation2 + $0x4d8] sm:$0xff] }
  0xbb   :  { %2160 = vmatprep.subr.bf16.mxu1 %v4382_v1  ;;  %2851 = vperm.xlu1 %4851, %v4536_v15   ;;  %v4383_v1 = vcombine.low %v193_v49, %v209_v50  ;;  %v4385_v14 = vcombine.low %v194_v62, %v210_v63  ;;  %v258_v15 = vld [vmem:[#allocation2 + $0x658] sm:$0xff] }
  0xbc   :  { %2118 = vmatpush1.bf16.msra.mxu0 %v4379_v58  ;;  %v4384_v58 = vcombine.high %v193_v49, %v209_v50  ;;  %v148_v49 = vld [vmem:[#allocation2 + $0x2e8] sm:$0xff] }
  0xbd   :  { %2119 = vmatprep.subr.bf16.mxu0 %v4412_v60  ;;  %v4321_v60 = vcombine.low %v130_v46, %v146_v6  ;;  %v163_v46 = vld [vmem:[#allocation2 + $0x360] sm:$0xff] }
  0xbe   :  { %2161 = vmatpush1.bf16.msra.mxu1 %v4381_v11  ;;  %v289_v11 = vld [vmem:[#allocation2 + $0x750] sm:$0xff] }
  0xbf   :  { %2162 = vmatprep.subr.bf16.mxu1 %v4414_v13  ;;  %v4448_v13 = vcombine.high %v257_v2, %v273_v3  ;;  %v4480_v21 = vcombine.high %v289_v11, %v305_v12  ;;  %v4479_v26 = vcombine.low %v289_v11, %v305_v12  ;;  %v212_v2 = vld [vmem:[#allocation2 + $0x4e8] sm:$0xff] }
  0xc0   :  { %2120 = vmatpush1.bf16.msra.mxu0 %v4411_v5  ;;  %v4353_v5 = vcombine.low %v162_v53, %v178_v55  ;;  %v195_v53 = vld [vmem:[#allocation2 + $0x460] sm:$0xff]  ;;  %v244_v11 = vld [vmem:[#allocation2 + $0x5e8] sm:$0xff] }
  0xc1   :  { %2121 = vmatprep.subr.bf16.mxu0 %v4444_v8  ;;  %v4386_v8 = vcombine.high %v194_v62, %v210_v63  ;;  %v243_v62 = vld [vmem:[#allocation2 + $0x5e0] sm:$0xff] }
  0xc2   :  { %2163 = vmatpush1.bf16.msra.mxu1 %v4413_v20  ;;  %v83_v20 = vld [vmem:[#allocation2 + $0xe0] sm:$0xff] }
  0xc3   :  { %2164 = vmatprep.subr.bf16.mxu1 %v4446_v22  ;;  %v4417_v22 = vcombine.low %v226_v7, %v242_v9 }
  0xc4   :  { %2122 = vmatpush1.bf16.msra.mxu0 %v4443_v16  ;;  %v4418_v16 = vcombine.high %v226_v7, %v242_v9  ;;  %v259_v7 = vld [vmem:[#allocation2 + $0x660] sm:$0xff] }
  0xc5   :  { %2123 = vmatprep.subr.bf16.mxu0 %v4476_v19  ;;  %v67_v19 = vld [vmem:[#allocation2 + $0x60] sm:$0xff] }
  0xc6   :  { %2165 = vmatpush1.bf16.msra.mxu1 %v4445_v28  ;;  %v4260_v27 = vcombine.high %v67_v19, %v83_v20  ;;  %v4449_v28 = vcombine.low %v258_v15, %v274_v17  ;;  %v4259_v34 = vcombine.low %v67_v19, %v83_v20  ;;  %v276_v19 = vld [vmem:[#allocation2 + $0x6e8] sm:$0xff] }
  0xc7   :  { %2166 = vmatprep.subr.bf16.mxu1 %v4478_v29  ;;  %v99_v29 = vld [vmem:[#allocation2 + $0x160] sm:$0xff] }
  0xc8   :  { %2124 = vmatpush1.bf16.msra.mxu0 %v4475_v24  ;;  %v4450_v24 = vcombine.high %v258_v15, %v274_v17  ;;  %v4291_v43 = vcombine.low %v99_v29, %v115_v30  ;;  %v291_v15 = vld [vmem:[#allocation2 + $0x760] sm:$0xff] }
  0xc9   :  { %2195 = vmatprep.subr.bf16.mxu0 %v4256_v25  ;;  %v306_v25 = vld [vmem:[#allocation2 + $0x7d8] sm:$0xff] }
  0xca   :  { %2167 = vmatpush1.bf16.msra.mxu1 %v4477_v36  ;;  %v4482_v31 = vcombine.high %v290_v23, %v306_v25  ;;  %v4481_v36 = vcombine.low %v290_v23, %v306_v25  ;;  %v69_v23 = vld [vmem:[#allocation2 + $0x70] sm:$0xff] }
  0xcb   :  { %2142 = vmatmul.mubr.bf16.vlgmr.msra.gmra.mrb[16].mxu0 %v5327_v40  ;;  %2238 = vmatprep.subr.bf16.mxu1 %v4258_v38  ;;  %v147_v38 = vld [vmem:[#allocation2 + $0x2e0] sm:$0xff] }
  0xcc   :  { %2196 = vmatpush1.bf16.msra.mxu0 %v4255_v32  ;;  %2227 = vmatprep.mubr.bf16.mxu0 %v5188_v0  ;;  %v68_v32 = vld [vmem:[#allocation2 + $0x68] sm:$0xff]  ;;  %v4323_v50 = vcombine.low %v131_v37, %v147_v38 }
  0xcd   :  { %2197 = vmatprep.subr.bf16.mxu0 %v4288_v35  ;;  %2185 = vmatmul.mubr.bf16.vlgmr.msra.gmra.mrb[16].mxu1 %v5327_v40  ;;  %v4292_v35 = vcombine.high %v99_v29, %v115_v30  ;;  %v4262_v39 = vcombine.high %v68_v32, %v84_v33 }
  0xce   :  { %2239 = vmatpush1.bf16.msra.mxu1 %v4257_v45  ;;  %2270 = vmatprep.mubr.bf16.mxu1 %v5188_v0  ;;  %v4261_v45 = vcombine.low %v68_v32, %v84_v33  ;;  %v117_v32 = vld [vmem:[#allocation2 + $0x1f0] sm:$0xff] }
  0xcf   :  { %2240 = vmatprep.subr.bf16.mxu1 %v4290_v47  ;;  %v179_v47 = vld [vmem:[#allocation2 + $0x3e0] sm:$0xff] }
  0xd0   :  { %2198 = vmatpush1.bf16.msra.mxu0 %v4287_v41  ;;  %v100_v41 = vld [vmem:[#allocation2 + $0x168] sm:$0xff] }
  0xd1   :  { %2199 = vmatprep.subr.bf16.mxu0 %v4320_v44  ;;  %v4324_v44 = vcombine.high %v131_v37, %v147_v38  ;;  %v4294_v6 = vcombine.high %v100_v41, %v116_v42 }
  0xd2   :  { %2241 = vmatpush1.bf16.msra.mxu1 %v4289_v52  ;;  %v4293_v52 = vcombine.low %v100_v41, %v116_v42  ;;  %v149_v41 = vld [vmem:[#allocation2 + $0x2f0] sm:$0xff] }
  0xd3   :  { %2242 = vmatprep.subr.bf16.mxu1 %v4322_v54  ;;  %v211_v54 = vld [vmem:[#allocation2 + $0x4e0] sm:$0xff] }
  0xd4   :  { %2200 = vmatpush1.bf16.msra.mxu0 %v4319_v48  ;;  %v132_v48 = vld [vmem:[#allocation2 + $0x268] sm:$0xff]  ;;  %v4388_v59 = vcombine.high %v195_v53, %v211_v54  ;;  %v4387_v3 = vcombine.low %v195_v53, %v211_v54 }
  0xd5   :  { %2201 = vmatprep.subr.bf16.mxu0 %v4352_v51  ;;  %v4356_v51 = vcombine.high %v163_v46, %v179_v47  ;;  %v4326_v55 = vcombine.high %v132_v48, %v148_v49 }
  0xd6   :  { %2243 = vmatpush1.bf16.msra.mxu1 %v4321_v60  ;;  %v4325_v60 = vcombine.low %v132_v48, %v148_v49  ;;  %v181_v48 = vld [vmem:[#allocation2 + $0x3f0] sm:$0xff] }
  0xd7   :  { %2244 = vmatprep.subr.bf16.mxu1 %v4354_v61  ;;  %v227_v61 = vld [vmem:[#allocation2 + $0x560] sm:$0xff] }
  0xd8   :  { %2202 = vmatpush1.bf16.msra.mxu0 %v4351_v56  ;;  %v164_v56 = vld [vmem:[#allocation2 + $0x368] sm:$0xff]  ;;  %v4419_v12 = vcombine.low %v227_v61, %v243_v62 }
  0xd9   :  { %2203 = vmatprep.subr.bf16.mxu0 %v4384_v58  ;;  %v4355_v58 = vcombine.low %v163_v46, %v179_v47  ;;  %v4358_v63 = vcombine.high %v164_v56, %v180_v57 }
  0xda   :  { %2245 = vmatpush1.bf16.msra.mxu1 %v4353_v5  ;;  %v4357_v5 = vcombine.low %v164_v56, %v180_v57  ;;  %v197_v56 = vld [vmem:[#allocation2 + $0x470] sm:$0xff] }
  0xdb   :  { %2246 = vmatprep.subr.bf16.mxu1 %v4386_v8  ;;  %v275_v8 = vld [vmem:[#allocation2 + $0x6e0] sm:$0xff]  ;;  %v213_v57 = vld [vmem:[#allocation2 + $0x4f0] sm:$0xff] }
  0xdc   :  { %2204 = vmatpush1.bf16.msra.mxu0 %v4383_v1  ;;  %v196_v1 = vld [vmem:[#allocation2 + $0x468] sm:$0xff]  ;;  %v4451_v20 = vcombine.low %v259_v7, %v275_v8 }
  0xdd   :  { %2205 = vmatprep.subr.bf16.mxu0 %v4416_v4  ;;  %v4420_v4 = vcombine.high %v227_v61, %v243_v62  ;;  %v4390_v9 = vcombine.high %v196_v1, %v212_v2  ;;  %v182_v61 = vld [vmem:[#allocation2 + $0x3f8] sm:$0xff] }
  0xde   :  { %2247 = vmatpush1.bf16.msra.mxu1 %v4385_v14  ;;  %v4389_v14 = vcombine.low %v196_v1, %v212_v2  ;;  %v229_v2 = vld [vmem:[#allocation2 + $0x570] sm:$0xff] }
  0xdf   :  { %2248 = vmatprep.subr.bf16.mxu1 %v4418_v16  ;;  %v307_v16 = vld [vmem:[#allocation2 + $0x7e0] sm:$0xff] }
  0xe0   :  { %2206 = vmatpush1.bf16.msra.mxu0 %v4415_v10  ;;  %v228_v10 = vld [vmem:[#allocation2 + $0x568] sm:$0xff] }
  0xe1   :  { %2207 = vmatprep.subr.bf16.mxu0 %v4448_v13  ;;  %v4452_v13 = vcombine.high %v259_v7, %v275_v8  ;;  %v4422_v17 = vcombine.high %v228_v10, %v244_v11  ;;  %v198_v7 = vld [vmem:[#allocation2 + $0x478] sm:$0xff] }
  0xe2   :  { %2249 = vmatpush1.bf16.msra.mxu1 %v4417_v22  ;;  %v4421_v22 = vcombine.low %v228_v10, %v244_v11  ;;  %v214_v8 = vld [vmem:[#allocation2 + $0x4f8] sm:$0xff] }
  0xe3   :  { %2250 = vmatprep.subr.bf16.mxu1 %v4450_v24  ;;  %v85_v24 = vld [vmem:[#allocation2 + $0xf0] sm:$0xff] }
  0xe4   :  { %2208 = vmatpush1.bf16.msra.mxu0 %v4447_v18  ;;  %v260_v18 = vld [vmem:[#allocation2 + $0x668] sm:$0xff]  ;;  %v4264_v29 = vcombine.high %v69_v23, %v85_v24 }
  0xe5   :  { %2209 = vmatprep.subr.bf16.mxu0 %v4480_v21  ;;  %v4484_v21 = vcombine.high %v291_v15, %v307_v16  ;;  %v4454_v25 = vcombine.high %v260_v18, %v276_v19  ;;  %v4453_v30 = vcombine.low %v260_v18, %v276_v19  ;;  %v246_v18 = vld [vmem:[#allocation2 + $0x5f8] sm:$0xff] }
  0xe6   :  { %2251 = vmatpush1.bf16.msra.mxu1 %v4449_v28  ;;  %v4483_v28 = vcombine.low %v291_v15, %v307_v16  ;;  %v4394_v15 = vcombine.high %v198_v7, %v214_v8 }
  0xe7   :  { %2252 = vmatprep.subr.bf16.mxu1 %v4482_v31  ;;  %v101_v31 = vld [vmem:[#allocation2 + $0x170] sm:$0xff] }
  0xe8   :  { %2210 = vmatpush1.bf16.msra.mxu0 %v4479_v26  ;;  %v292_v26 = vld [vmem:[#allocation2 + $0x768] sm:$0xff]  ;;  %v4296_v37 = vcombine.high %v101_v31, %v117_v32 }
  0xe9   :  { %2281 = vmatprep.subr.bf16.mxu0 %v4260_v27  ;;  %v308_v27 = vld [vmem:[#allocation2 + $0x7e8] sm:$0xff] }
  0xea   :  { %2253 = vmatpush1.bf16.msra.mxu1 %v4481_v36  ;;  %v4486_v33 = vcombine.high %v292_v26, %v308_v27  ;;  %v4263_v36 = vcombine.low %v69_v23, %v85_v24  ;;  %v4485_v38 = vcombine.low %v292_v26, %v308_v27  ;;  %v293_v24 = vld [vmem:[#allocation2 + $0x770] sm:$0xff] }
  0xeb   :  { %2228 = vmatmul.mubr.bf16.vlgmr.msra.gmra.mrb[20].mxu0 %v5327_v40  ;;  %2324 = vmatprep.subr.bf16.mxu1 %v4262_v39  ;;  %v133_v39 = vld [vmem:[#allocation2 + $0x270] sm:$0xff] }
  0xec   :  { %2282 = vmatpush1.bf16.msra.mxu0 %v4259_v34  ;;  %2313 = vmatprep.mubr.bf16.mxu0 %v5188_v0  ;;  %v70_v34 = vld [vmem:[#allocation2 + $0x78] sm:$0xff]  ;;  %v4328_v46 = vcombine.high %v133_v39, %v149_v41  ;;  %v4327_v53 = vcombine.low %v133_v39, %v149_v41 }
  0xed   :  { %2283 = vmatprep.subr.bf16.mxu0 %v4292_v35  ;;  %2271 = vmatmul.mubr.bf16.vlgmr.msra.gmra.mrb[20].mxu1 %v5327_v40  ;;  %v86_v35 = vld [vmem:[#allocation2 + $0xf8] sm:$0xff] }
  0xee   :  { %2325 = vmatpush1.bf16.msra.mxu1 %v4261_v45  ;;  %2356 = vmatprep.mubr.bf16.mxu1 %v5188_v0  ;;  %v4266_v42 = vcombine.high %v70_v34, %v86_v35  ;;  %v4295_v45 = vcombine.low %v101_v31, %v117_v32  ;;  %v4265_v47 = vcombine.low %v70_v34, %v86_v35 }
  0xef   :  { %2326 = vmatprep.subr.bf16.mxu1 %v4294_v6  ;;  %v165_v6 = vld [vmem:[#allocation2 + $0x370] sm:$0xff] }
  0xf0   :  { %2284 = vmatpush1.bf16.msra.mxu0 %v4291_v43  ;;  %v102_v43 = vld [vmem:[#allocation2 + $0x178] sm:$0xff]  ;;  %v4360_v54 = vcombine.high %v165_v6, %v181_v48  ;;  %v4359_v62 = vcombine.low %v165_v6, %v181_v48 }
  0xf1   :  { %2285 = vmatprep.subr.bf16.mxu0 %v4324_v44  ;;  %v118_v44 = vld [vmem:[#allocation2 + $0x1f8] sm:$0xff] }
  0xf2   :  { %2327 = vmatpush1.bf16.msra.mxu1 %v4293_v52  ;;  %v4298_v49 = vcombine.high %v102_v43, %v118_v44  ;;  %v150_v52 = vld [vmem:[#allocation2 + $0x2f8] sm:$0xff] }
  0xf3   :  { %2328 = vmatprep.subr.bf16.mxu1 %v4326_v55  ;;  %v4297_v55 = vcombine.low %v102_v43, %v118_v44 }
  0xf4   :  { %2286 = vmatpush1.bf16.msra.mxu0 %v4323_v50  ;;  %v319_v50 = vlaneseq }
  0xf5   :  { %2287 = vmatprep.subr.bf16.mxu0 %v4356_v51  ;;  %v134_v51 = vld [vmem:[#allocation2 + $0x278] sm:$0xff] }
  0xf6   :  { %2329 = vmatpush1.bf16.msra.mxu1 %v4325_v60  ;;  %v166_v60 = vld [vmem:[#allocation2 + $0x378] sm:$0xff]  ;;  %v4329_v1 = vcombine.low %v134_v51, %v150_v52 }
  0xf7   :  { %2330 = vmatprep.subr.bf16.mxu1 %v4358_v63  ;;  %v4392_v63 = vcombine.high %v197_v56, %v213_v57 }
  0xf8   :  { %2288 = vmatpush1.bf16.msra.mxu0 %v4355_v58  ;;  %v4330_v58 = vcombine.high %v134_v51, %v150_v52 }
  0xf9   :  { %2289 = vmatprep.subr.bf16.mxu0 %v4388_v59  ;;  %v5341_v59 = vshrl.u32 %v319_v50, 7 }
  0xfa   :  { %2331 = vmatpush1.bf16.msra.mxu1 %v4357_v5 }
  0xfb   :  { %2332 = vmatprep.subr.bf16.mxu1 %v4390_v9  ;;  %v5344_v5 = vsub.s32 0, %v5341_v59  ;;  %v5349_v9 = vld [vmem:[%s5605_s5] sm:$0xff]  ;;  %v5352_v10 = vsub.s32 1, %v5341_v59 }
  0xfc   :  { %2290 = vmatpush1.bf16.msra.mxu0 %v4387_v3  ;;  %v245_v3 = vld [vmem:[#allocation2 + $0x5f0] sm:$0xff] }
  0xfd   :  { %2291 = vmatprep.subr.bf16.mxu0 %v4420_v4  ;;  %v4362_v4 = vcombine.high %v166_v60, %v182_v61  ;;  %v4424_v11 = vcombine.high %v229_v2, %v245_v3  ;;  %v322_v16 = vrot.slane %v5349_v9, %v5344_v5  ;;  %v326_v19 = vrot.slane %v5349_v9, %v5352_v10 }
  0xfe   :  { %2333 = vmatpush1.bf16.msra.mxu1 %v4389_v14  ;;  %v277_v14 = vld [vmem:[#allocation2 + $0x6f0] sm:$0xff] }
  0xff   :  { %2334 = vmatprep.subr.bf16.mxu1 %v4422_v17  ;;  %v230_v17 = vld [vmem:[#allocation2 + $0x578] sm:$0xff] }
 0x100   :  { %2292 = vmatpush1.bf16.msra.mxu0 %v4419_v12  ;;  %v4361_v12 = vcombine.low %v166_v60, %v182_v61  ;;  %v4426_v26 = vcombine.high %v230_v17, %v246_v18  ;;  %v4857_v61 = vld [vmem:[#allocation5 + $0x50] sm:$0xff]  }
 0x101   :  { %2293 = vmatprep.subr.bf16.mxu0 %v4452_v13  ;;  %v261_v13 = vld [vmem:[#allocation2 + $0x670] sm:$0xff] }
 0x102   :  { %2335 = vmatpush1.bf16.msra.mxu1 %v4421_v22  ;;  %v4393_v22 = vcombine.low %v198_v7, %v214_v8 }
 0x103   :  { %2336 = vmatprep.subr.bf16.mxu1 %v4454_v25  ;;  %v309_v25 = vld [vmem:[#allocation2 + $0x7f0] sm:$0xff] }
 0x104   :  { %2294 = vmatpush1.bf16.msra.mxu0 %v4451_v20  ;;  %v4423_v20 = vcombine.low %v229_v2, %v245_v3  ;;  %v4487_v6 = vcombine.low %v293_v24, %v309_v25  ;;  %v4871_v2 = vld [vmem:[#allocation5 + $0xc8] sm:$0xff]  }
 0x105   :  { %2295 = vmatprep.subr.bf16.mxu0 %v4484_v21  ;;  %v4456_v21 = vcombine.high %v261_v13, %v277_v14 }
 0x106   :  { %2337 = vmatpush1.bf16.msra.mxu1 %v4453_v30  ;;  %v278_v30 = vld [vmem:[#allocation2 + $0x6f8] sm:$0xff] }
 0x107   :  { %2338 = vmatprep.subr.bf16.mxu1 %v4486_v33  ;;  %v4455_v33 = vcombine.low %v261_v13, %v277_v14  ;;  %v5381_v13 = vsub.s32 2, %v5341_v59  ;;  %v4872_v14 = vld [vmem:[#allocation5 + $0x88] sm:$0xff]  }
 0x108   :  { %2296 = vmatpush1.bf16.msra.mxu0 %v4483_v28 }
 0x109   :  { %2367 = vmatprep.subr.bf16.mxu0 %v4264_v29  ;;  %v262_v29 = vld [vmem:[#allocation2 + $0x678] sm:$0xff] }
 0x10a   :  { %2339 = vmatpush1.bf16.msra.mxu1 %v4485_v38  ;;  %v4425_v38 = vcombine.low %v230_v17, %v246_v18  ;;  %v4457_v51 = vcombine.low %v262_v29, %v278_v30  ;;  %v4860_v17 = vld [vmem:[#allocation5 + $0x18] sm:$0xff]   ;;  %v4861_v18 = vld [vmem:[#allocation5 + $0x60] sm:$0xff]  }
 0x10b   :  { %2314 = vmatmul.mubr.bf16.vlgmr.msra.gmra.mrb[24].mxu0 %v5327_v40  ;;  %2410 = vmatprep.subr.bf16.mxu1 %v4266_v42  ;;  %v4458_v42 = vcombine.high %v262_v29, %v278_v30  ;;  %v4876_v29 = vld [vmem:[#allocation5 + $0x98] sm:$0xff]  }
 0x10c   :  { %2368 = vmatpush1.bf16.msra.mxu0 %v4263_v36  ;;  %2399 = vmatprep.mubr.bf16.mxu0 %v5188_v0 }
 0x10d   :  { %2369 = vmatprep.subr.bf16.mxu0 %v4296_v37  ;;  %2357 = vmatmul.mubr.bf16.vlgmr.msra.gmra.mrb[24].mxu1 %v5327_v40  ;;  %v4488_v37 = vcombine.high %v293_v24, %v309_v25  ;;  %v4862_v24 = vld [vmem:[#allocation5 + $0x20] sm:$0xff]   ;;  %v5394_v25 = vsub.s32 5, %v5341_v59 }
 0x10e   :  { %2411 = vmatpush1.bf16.msra.mxu1 %v4265_v47  ;;  %2442 = vmatprep.mubr.bf16.mxu1 %v5188_v0  ;;  %v4391_v0 = vcombine.low %v197_v56, %v213_v57  ;;  %v4868_v57 = vld [vmem:[#allocation5 + $0xc0] sm:$0xff]  }
 0x10f   :  { %2412 = vmatprep.subr.bf16.mxu1 %v4298_v49  ;;  %v4853_v49 = vld [vmem:[#allocation5 + $0x40] sm:$0xff]  }
 0x110   :  { %2370 = vmatpush1.bf16.msra.mxu0 %v4295_v45  ;;  %v294_v45 = vld [vmem:[#allocation2 + $0x778] sm:$0xff] }
 0x111   :  { %2371 = vmatprep.subr.bf16.mxu0 %v4328_v46  ;;  %v310_v46 = vld [vmem:[#allocation2 + $0x7f8] sm:$0xff] }
 0x112   :  { %2413 = vmatpush1.bf16.msra.mxu1 %v4297_v55  ;;  %v4855_v55 = vld [vmem:[#allocation5 + $0x48] sm:$0xff]   ;;  %v4489_v56 = vcombine.low %v294_v45, %v310_v46 }
 0x113   :  { %2414 = vmatprep.subr.bf16.mxu1 %v4330_v58  ;;  %v4856_v58 = vld [vmem:[#allocation5 + $0x8] sm:$0xff]  }
 0x114   :  { %2372 = vmatpush1.bf16.msra.mxu0 %v4327_v53  ;;  %v4490_v53 = vcombine.high %v294_v45, %v310_v46 }
 0x115   :  { %2373 = vmatprep.subr.bf16.mxu0 %v4360_v54  ;;  %v4854_v54 = vld [vmem:[#allocation5] sm:$0xff]  }
 0x116   :  { %2415 = vmatpush1.bf16.msra.mxu1 %v4329_v1 }
 0x117   :  { %2416 = vmatprep.subr.bf16.mxu1 %v4362_v4 }
 0x118   :  { %2374 = vmatpush1.bf16.msra.mxu0 %v4359_v62  ;;  %v4870_v62 = vld [vmem:[#allocation5 + $0x80] sm:$0xff]  }
 0x119   :  { %2375 = vmatprep.subr.bf16.mxu0 %v4392_v63 }
 0x11a   :  { %2417 = vmatpush1.bf16.msra.mxu1 %v4361_v12  ;;  %v4859_v12 = vld [vmem:[#allocation5 + $0x58] sm:$0xff]  }
 0x11b   :  { %2418 = vmatprep.subr.bf16.mxu1 %v4394_v15  ;;  %v5384_v15 = vsub.s32 3, %v5341_v59 }
 0x11c   :  { %2376 = vmatpush1.bf16.msra.mxu0 %v4391_v0  ;;  %v4858_v0 = vld [vmem:[#allocation5 + $0x10] sm:$0xff]  }
 0x11d   :  { %2377 = vmatprep.subr.bf16.mxu0 %v4424_v11 }
 0x11e   :  { %v1799_v23 = vpop.f32.mrb[0].mxu0  ;;  %2419 = vmatpush1.bf16.msra.mxu1 %v4393_v22  ;;  %v5369_v44 = vpop.f32.mrb[0].mxu1  ;;  %v5391_v22 = vsub.s32 4, %v5341_v59 }
 0x11f   :  { %v5358_v27 = vadd.f32 %v1799_v23, %v322_v16  ;;  %v1801_v28 = vpop.f32.mrb[1].mxu0  ;;  %2420 = vmatprep.subr.bf16.mxu1 %v4426_v26  ;;  %v5372_v48 = vpop.f32.mrb[1].mxu1 }
 0x120   :  { %v5360_v31 = vadd.f32 %v1801_v28, %v326_v19  ;;  %v1803_v32 = vpop.f32.mrb[2].mxu0  ;;  %2378 = vmatpush1.bf16.msra.mxu0 %v4423_v20  ;;  %v5374_v50 = vpop.f32.mrb[2].mxu1  ;;  %v334_v20 = vrot.slane %v5349_v9, %v5384_v15  ;;  %v4863_v28 = vld [vmem:[#allocation5 + $0x68] sm:$0xff]  }
 0x121   :  { %v4491_v34 = vmul.f32 -1.442695, %v5358_v27  ;;  %v5363_v35 = vadd.f32 %v1803_v32, %v322_v16  ;;  %v1805_v36 = vpop.f32.mrb[3].mxu0  ;;  %2379 = vmatprep.subr.bf16.mxu0 %v4456_v21  ;;  %v5376_v52 = vpop.f32.mrb[3].mxu1  ;;  %v4873_v16 = vld [vmem:[#allocation5 + $0xd0] sm:$0xff]   ;;  %v4875_v21 = vld [vmem:[#allocation5 + $0xd8] sm:$0xff]  }
 0x122   :  { %v4492_v39 = vmul.f32 -1.442695, %v5360_v31  ;;  %v5366_v41 = vadd.f32 %v1805_v36, %v326_v19  ;;  %2421 = vmatpush1.bf16.msra.mxu1 %v4425_v38  ;;  %v4874_v19 = vld [vmem:[#allocation5 + $0x90] sm:$0xff]   ;;  %v2490_v23 = vpop.permute.xlu0 %2489  ;;  %v1845_v32 = vadd.f32 %v5372_v48, %v334_v20  ;;  %v338_v38 = vrot.slane %v5349_v9, %v5391_v22 }
 0x123   :  { %4981 = vpow2.f32 %v4491_v34  ;;  %v4493_v43 = vmul.f32 -1.442695, %v5363_v35  ;;  %2422 = vmatprep.subr.bf16.mxu1 %v4458_v42 }
 0x124   :  { %4983 = vpow2.f32 %v4492_v39  ;;  %v4494_v47 = vmul.f32 -1.442695, %v5366_v41  ;;  %2380 = vmatpush1.bf16.msra.mxu0 %v4455_v33  ;;  %v4877_v33 = vld [vmem:[#allocation5 + $0xe0] sm:$0xff]  }
 0x125   :  { %4985 = vpow2.f32 %v4493_v43  ;;  %2381 = vmatprep.subr.bf16.mxu0 %v4488_v37  ;;  %v342_v43 = vrot.slane %v5349_v9, %v5394_v25 }
 0x126   :  { %4987 = vpow2.f32 %v4494_v47  ;;  %2423 = vmatpush1.bf16.msra.mxu1 %v4457_v51 }
 0x127   :  { %2424 = vmatprep.subr.bf16.mxu1 %v4490_v53  ;;  %v4879_v53 = vld [vmem:[#allocation5 + $0xe8] sm:$0xff]  }
 0x128   :  { %2382 = vmatpush1.bf16.msra.mxu0 %v4487_v6  ;;  %v4865_v6 = vld [vmem:[#allocation5 + $0x70] sm:$0xff]  }
 0x129   :  { %4665 = vmatprep.subr.bf16.mxu0 %v4853_v49 }
 0x12a   :  { %2425 = vmatpush1.bf16.msra.mxu1 %v4489_v56 }
 0x12b   :  { %2400 = vmatmul.mubr.bf16.vlgmr.msra.gmra.mrb[28].mxu0 %v5327_v40  ;;  %4687 = vmatprep.subr.bf16.mxu1 %v4868_v57 }
 0x12c   :  { %4666 = vmatpush3.bf16.msra.mxu0 %v4854_v54 }
 0x12d   :  { %v4982_v60 = vpop.eup %4981  ;;  %4667 = vmatprep.subr.bf16.mxu0 %v4855_v55  ;;  %2443 = vmatmul.mubr.bf16.vlgmr.msra.gmra.mrb[28].mxu1 %v5327_v40  ;;  %v330_v40 = vrot.slane %v5349_v9, %v5381_v13 }
 0x12e   :  { %v4984_v63 = vpop.eup %4983  ;;  %v2465_v1 = vadd.f32 1.0, %v4982_v60  ;;  %4688 = vmatpush3.bf16.msra.mxu1 %v4870_v62  ;;  %v4866_v60 = vld [vmem:[#allocation5 + $0x30] sm:$0xff]  }
 0x12f   :  { %v4986_v3 = vpop.eup %4985  ;;  %v2466_v4 = vadd.f32 1.0, %v4984_v63  ;;  %4689 = vmatprep.subr.bf16.mxu1 %v4871_v2  ;;  %v1843_v26 = vadd.f32 %v5369_v44, %v330_v40  ;;  %v1847_v37 = vadd.f32 %v5374_v50, %v330_v40  ;;  %v4864_v44 = vld [vmem:[#allocation5 + $0x28] sm:$0xff]   ;;  %v1849_v50 = vadd.f32 %v5376_v52, %v334_v20  ;;  %v4869_v40 = vld [vmem:[#allocation5 + $0x38] sm:$0xff]   ;;  %v4882_v20 = vld [vmem:[#allocation5 + $0xb0] sm:$0xff]  }
 0x130   :  { %v4988_v7 = vpop.eup %4987  ;;  %4989 = vrcp.f32 %v2465_v1  ;;  %v2467_v8 = vadd.f32 1.0, %v4986_v3  ;;  %4668 = vmatpush3.bf16.msra.mxu0 %v4856_v58  ;;  %v4867_v1 = vld [vmem:[#allocation5 + $0x78] sm:$0xff]   ;;  %v4880_v2 = vld [vmem:[#allocation5 + $0xa8] sm:$0xff]  }
 0x131   :  { %4991 = vrcp.f32 %v2466_v4  ;;  %v2468_v11 = vadd.f32 1.0, %v4988_v7  ;;  %4669 = vmatprep.subr.bf16.mxu0 %v4857_v61 }
 0x132   :  { %4993 = vrcp.f32 %v2467_v8  ;;  %4690 = vmatpush3.bf16.msra.mxu1 %v4872_v14 }
 0x133   :  { %4995 = vrcp.f32 %v2468_v11  ;;  %4691 = vmatprep.subr.bf16.mxu1 %v4873_v16 }
 0x134   :  { %4670 = vmatpush3.bf16.msra.mxu0 %v4858_v0  ;;  %v4881_v0 = vld [vmem:[#allocation5 + $0xf0] sm:$0xff]  }
 0x135   :  { %4671 = vmatprep.subr.bf16.mxu0 %v4859_v12 }
 0x136   :  { %4692 = vmatpush3.bf16.msra.mxu1 %v4874_v19 }
 0x137   :  { %4693 = vmatprep.subr.bf16.mxu1 %v4875_v21  ;;  %v4885_v21 = vld [vmem:[#allocation5 + $0x140] sm:$0xff]  }
 0x138   :  { %4672 = vmatpush3.bf16.msra.mxu0 %v4860_v17 }
 0x139   :  { %4673 = vmatprep.subr.bf16.mxu0 %v4861_v18 }
 0x13a   :  { %v4990_v30 = vpop.eup %4989  ;;  %4694 = vmatpush3.bf16.msra.mxu1 %v4876_v29  ;;  %v4887_v29 = vld [vmem:[#allocation5 + $0x148] sm:$0xff]  }
 0x13b   :  { %v4992_v34 = vpop.eup %4991  ;;  %v2477_v36 = vmul.f32 %v4990_v30, %v5358_v27  ;;  %v4878_v27 = vld [vmem:[#allocation5 + $0xa0] sm:$0xff]   ;;  %4695 = vmatprep.subr.bf16.mxu1 %v4877_v33 }
 0x13c   :  { %v4994_v39 = vpop.eup %4993  ;;  %v2478_v42 = vmul.f32 %v4992_v34, %v5360_v31  ;;  %4674 = vmatpush3.bf16.msra.mxu0 %v4862_v24  ;;  %v2495_v31 = vpop.permute.xlu0 %2494  ;;  %v4883_v24 = vld [vmem:[#allocation5 + $0xf8] sm:$0xff]   ;;  %v4901_v30 = vld [vmem:[#allocation5 + $0x1c0] sm:$0xff]   ;;  %v4889_v34 = vld [vmem:[#allocation5 + $0x150] sm:$0xff]  }
 0x13d   :  { %v4996_v45 = vpop.eup %4995  ;;  %v2479_v46 = vmul.f32 %v4994_v39, %v5363_v35  ;;  %v2481_v47 = vmul.f32 %v2477_v36, %v1843_v26  ;;  %4675 = vmatprep.subr.bf16.mxu0 %v4863_v28  ;;  %v4886_v26 = vld [vmem:[#allocation5 + $0x100] sm:$0xff]   ;;  %v4884_v28 = vld [vmem:[#allocation5 + $0xb8] sm:$0xff]  }
 0x13e   :  { %v2480_v48 = vmul.f32 %v4996_v45, %v5366_v41  ;;  %v2482_v49 = vmul.f32 %v2478_v42, %v1845_v32  ;;  %v1885_v51 = vpop.f32.mrb[4].mxu0  ;;  %4696 = vmatpush3.bf16.msra.mxu1 %v4878_v27  ;;  %v4888_v32 = vld [vmem:[#allocation5 + $0x108] sm:$0xff]   ;;  %v4892_v27 = vld [vmem:[#allocation5 + $0x118] sm:$0xff]  }
 0x13f   :  { %v2483_v54 = vmul.f32 %v2479_v46, %v1847_v37  ;;  %v5408_v55 = vadd.f32 %v1885_v51, %v338_v38  ;;  %v1887_v56 = vpop.f32.mrb[5].mxu0  ;;  %v2497_v61 = vmul.f32 %v2490_v23, %v2481_v47  ;;  %4697 = vmatprep.subr.bf16.mxu1 %v4879_v53  ;;  %v5423_v46 = vsub.s32 6, %v5341_v59  ;;  %v4891_v47 = vld [vmem:[#allocation5 + $0x158] sm:$0xff]   ;;  %v2541_v51 = vpop.permute.xlu1 %2540 }
 0x140   :  { %v2484_v57 = vmul.f32 %v2480_v48, %v1849_v50  ;;  %v5410_v35 = vadd.f32 %v1887_v56, %v342_v43  ;;  %v1889_v58 = vpop.f32.mrb[6].mxu0  ;;  %4676 = vmatpush3.bf16.msra.mxu0 %v4864_v44  ;;  %v2498_v3 = vmul.f32 %v2490_v23, %v2482_v49  ;;  %v1928_v14 = vpop.f32.mrb[4].mxu1  ;;  %v4890_v44 = vld [vmem:[#allocation5 + $0x110] sm:$0xff]   ;;  %v4893_v49 = vld [vmem:[#allocation5 + $0x160] sm:$0xff]  }
 0x141   :  { %v4495_v41 = vmul.f32 -1.442695, %v5408_v55  ;;  %v2499_v62 = vmul.f32 %v2495_v31, %v2483_v54  ;;  %v5413_v63 = vadd.f32 %v1889_v58, %v338_v38  ;;  %v1891_v52 = vpop.f32.mrb[7].mxu0  ;;  %4677 = vmatprep.subr.bf16.mxu0 %v4865_v6  ;;  %v1930_v18 = vpop.f32.mrb[5].mxu1  ;;  %v5426_v6 = vsub.s32 7, %v5341_v59  ;;  %v4894_v59 = vld [vmem:[#allocation5 + $0x120] sm:$0xff]  }
 0x142   :  { %v4496_v4 = vmul.f32 -1.442695, %v5410_v35  ;;  %v2500_v7 = vmul.f32 %v2495_v31, %v2484_v57  ;;  %v5416_v8 = vadd.f32 %v1891_v52, %v342_v43  ;;  %v1932_v19 = vpop.f32.mrb[6].mxu1  ;;  %4698 = vmatpush3.bf16.msra.mxu1 %v4880_v2  ;;  %v346_v48 = vrot.slane %v5349_v9, %v5423_v46  ;;  %v5435_v31 = vld [vmem:[%s5605_s5 + $0x8] sm:$0xff] }
 0x143   :  { %4997 = vpow2.f32 %v4495_v41  ;;  %v2501_v11 = vpack.c.bf16 %v2499_v62, %v2497_v61  ;;  %v4497_v12 = vmul.f32 -1.442695, %v5413_v63  ;;  %v5420_v23 = vpop.f32.mrb[7].mxu1  ;;  %4699 = vmatprep.subr.bf16.mxu1 %v4881_v0  ;;  %v350_v50 = vrot.slane %v5349_v9, %v5426_v6  ;;  %v4895_v54 = vld [vmem:[#allocation5 + $0x168] sm:$0xff]  }
 0x144   :  { %4999 = vpow2.f32 %v4496_v4  ;;  %v2502_v16 = vpack.c.bf16 %v2500_v7, %v2498_v3  ;;  %v4498_v17 = vmul.f32 -1.442695, %v5416_v8  ;;  %4678 = vmatpush3.bf16.msra.mxu0 %v4866_v60  ;;  %v1929_v53 = vadd.f32 %v1928_v14, %v346_v48  ;;  %v4897_v7 = vld [vmem:[#allocation5 + $0x170] sm:$0xff]   ;;  %v2546_v14 = vpop.permute.xlu1 %2545 }
 0x145   :  { %5001 = vpow2.f32 %v4497_v12  ;;  %4679 = vmatprep.subr.bf16.mxu0 %v4867_v1  ;;  %v1931_v57 = vadd.f32 %v1930_v18, %v350_v50  ;;  %v1933_v61 = vadd.f32 %v1932_v19, %v346_v48  ;;  %v354_v9 = vrot.slane %v5435_v31, %v5344_v5  ;;  %v4896_v1 = vld [vmem:[#allocation5 + $0x128] sm:$0xff]  }
 0x146   :  { %5003 = vpow2.f32 %v4498_v17  ;;  %3918 = vmatprep.mubr.bf16.mxu0 %v2502_v16  ;;  %4700 = vmatpush3.bf16.msra.mxu1 %v4882_v20  ;;  %v358_v52 = vrot.slane %v5435_v31, %v5352_v10  ;;  %v4904_v48 = vld [vmem:[#allocation5 + $0x188] sm:$0xff]  }
 0x147   :  { %4701 = vmatprep.subr.bf16.mxu1 %v4883_v24 }
 0x148   :  { %4680 = vmatpush3.bf16.msra.mxu0 %v4869_v40 }
 0x149   :  { %4709 = vmatprep.subr.bf16.mxu0 %v4885_v21 }
 0x14a   :  { %4702 = vmatpush3.bf16.msra.mxu1 %v4884_v28 }
 0x14b   :  { %3919 = vmatmul.mubr.bf16.vlgmr.msra.gmra.mrb[32].mxu0 %v2501_v11  ;;  %4731 = vmatprep.subr.bf16.mxu1 %v4901_v30  ;;  %v1935_v11 = vadd.f32 %v5420_v23, %v350_v50  ;;  %v4899_v23 = vld [vmem:[#allocation5 + $0x178] sm:$0xff]   ;;  %v4906_v50 = vld [vmem:[#allocation5 + $0x190] sm:$0xff]  }
 0x14c   :  { %4710 = vmatpush3.bf16.msra.mxu0 %v4886_v26 }
 0x14d   :  { %v4998_v33 = vpop.eup %4997  ;;  %4711 = vmatprep.subr.bf16.mxu0 %v4887_v29 }
 0x14e   :  { %v5000_v36 = vpop.eup %4999  ;;  %v2515_v37 = vadd.f32 1.0, %v4998_v33 }
 0x14f   :  { %v5002_v38 = vpop.eup %5001  ;;  %v2516_v39 = vadd.f32 1.0, %v5000_v36 }
 0x150   :  { %v5004_v42 = vpop.eup %5003  ;;  %5005 = vrcp.f32 %v2515_v37  ;;  %v2517_v43 = vadd.f32 1.0, %v5002_v38  ;;  %4712 = vmatpush3.bf16.msra.mxu0 %v4888_v32 }
 0x151   :  { %5007 = vrcp.f32 %v2516_v39  ;;  %v2518_v45 = vadd.f32 1.0, %v5004_v42  ;;  %4713 = vmatprep.subr.bf16.mxu0 %v4889_v34  ;;  %v4900_v42 = vld [vmem:[#allocation5 + $0x138] sm:$0xff]  }
 0x152   :  { %5009 = vrcp.f32 %v2517_v43  ;;  %v4902_v43 = vld [vmem:[#allocation5 + $0x180] sm:$0xff]  }
 0x153   :  { %5011 = vrcp.f32 %v2518_v45  ;;  %v4903_v45 = vld [vmem:[#allocation5 + $0x1c8] sm:$0xff]  }
 0x154   :  { %4714 = vmatpush3.bf16.msra.mxu0 %v4890_v44 }
 0x155   :  { %4715 = vmatprep.subr.bf16.mxu0 %v4891_v47  ;;  %v4917_v47 = vld [vmem:[#allocation5 + $0x240] sm:$0xff]  }
 0x158   :  { %4716 = vmatpush3.bf16.msra.mxu0 %v4892_v27 }
 0x159   :  { %4717 = vmatprep.subr.bf16.mxu0 %v4893_v49  ;;  %v4905_v49 = vld [vmem:[#allocation5 + $0x1d0] sm:$0xff]  }
 0x15a   :  { %v5006_v56 = vpop.eup %5005 }
 0x15b   :  { %v5008_v58 = vpop.eup %5007  ;;  %v2527_v60 = vmul.f32 %v5006_v56, %v5408_v55 }
 0x15c   :  { %v5010_v41 = vpop.eup %5009  ;;  %v2528_v62 = vmul.f32 %v5008_v58, %v5410_v35  ;;  %4718 = vmatpush3.bf16.msra.mxu0 %v4894_v59  ;;  %v4907_v59 = vld [vmem:[#allocation5 + $0x1d8] sm:$0xff]  }
 0x15d   :  { %v5012_v2 = vpop.eup %5011  ;;  %v2529_v3 = vmul.f32 %v5010_v41, %v5413_v63  ;;  %v2531_v4 = vmul.f32 %v2527_v60, %v1929_v53  ;;  %4719 = vmatprep.subr.bf16.mxu0 %v4895_v54  ;;  %v4898_v63 = vld [vmem:[#allocation5 + $0x130] sm:$0xff]   ;;  %v4909_v41 = vld [vmem:[#allocation5 + $0x1e0] sm:$0xff]  }
 0x15e   :  { %v2530_v55 = vmul.f32 %v5012_v2, %v5416_v8  ;;  %v2532_v0 = vmul.f32 %v2528_v62, %v1931_v57  ;;  %v1971_v12 = vpop.f32.mrb[8].mxu0  ;;  %v4910_v62 = vld [vmem:[#allocation5 + $0x1a0] sm:$0xff]   ;;  %v366_v2 = vrot.slane %v5435_v31, %v5384_v15 }
 0x15f   :  { %v2533_v16 = vmul.f32 %v2529_v3, %v1933_v61  ;;  %v5446_v35 = vadd.f32 %v1971_v12, %v354_v9  ;;  %v1973_v17 = vpop.f32.mrb[9].mxu0  ;;  %v2548_v20 = vmul.f32 %v2541_v51, %v2531_v4  ;;  %v4908_v61 = vld [vmem:[#allocation5 + $0x198] sm:$0xff]   ;;  %v4912_v3 = vld [vmem:[#allocation5 + $0x1a8] sm:$0xff]  }
 0x160   :  { %v2534_v40 = vmul.f32 %v2530_v55, %v1935_v11  ;;  %v5448_v18 = vadd.f32 %v1973_v17, %v358_v52  ;;  %v1975_v19 = vpop.f32.mrb[10].mxu0  ;;  %4720 = vmatpush3.bf16.msra.mxu0 %v4896_v1  ;;  %v2549_v28 = vmul.f32 %v2541_v51, %v2532_v0  ;;  %v2014_v36 = vpop.f32.mrb[8].mxu1  ;;  %v4911_v1 = vld [vmem:[#allocation5 + $0x1e8] sm:$0xff]  }
 0x161   :  { %v4501_v21 = vmul.f32 -1.442695, %v5446_v35  ;;  %v2550_v24 = vmul.f32 %v2546_v14, %v2533_v16  ;;  %v5451_v8 = vadd.f32 %v1975_v19, %v354_v9  ;;  %v1977_v26 = vpop.f32.mrb[11].mxu0  ;;  %4721 = vmatprep.subr.bf16.mxu0 %v4897_v7  ;;  %v2016_v39 = vpop.f32.mrb[9].mxu1  ;;  %v4913_v7 = vld [vmem:[#allocation5 + $0x1f0] sm:$0xff]   ;;  %v370_v16 = vrot.slane %v5435_v31, %v5391_v22 }
 0x162   :  { %v4502_v29 = vmul.f32 -1.442695, %v5448_v18  ;;  %v2551_v30 = vmul.f32 %v2546_v14, %v2534_v40  ;;  %v5454_v32 = vadd.f32 %v1977_v26, %v358_v52  ;;  %v2018_v44 = vpop.f32.mrb[10].mxu1  ;;  %v362_v52 = vrot.slane %v5435_v31, %v5381_v13  ;;  %v2592_v26 = vpop.permute.xlu0 %2591 }
 0x163   :  { %5013 = vpow2.f32 %v4501_v21  ;;  %v2552_v33 = vpack.c.bf16 %v2550_v24, %v2548_v20  ;;  %v4503_v34 = vmul.f32 -1.442695, %v5451_v8  ;;  %v2020_v27 = vpop.f32.mrb[11].mxu1  ;;  %v2017_v0 = vadd.f32 %v2016_v39, %v366_v2 }
 0x164   :  { %5015 = vpow2.f32 %v4502_v29  ;;  %v2553_v37 = vpack.c.bf16 %v2551_v30, %v2549_v28  ;;  %v4504_v38 = vmul.f32 -1.442695, %v5454_v32  ;;  %4722 = vmatpush3.bf16.msra.mxu0 %v4898_v63  ;;  %v2015_v4 = vadd.f32 %v2014_v36, %v362_v52  ;;  %v4914_v63 = vld [vmem:[#allocation5 + $0x1b0] sm:$0xff]  }
 0x165   :  { %5017 = vpow2.f32 %v4503_v34  ;;  %4723 = vmatprep.subr.bf16.mxu0 %v4899_v23  ;;  %v2019_v14 = vadd.f32 %v2018_v44, %v362_v52  ;;  %v374_v19 = vrot.slane %v5435_v31, %v5394_v25  ;;  %v4915_v23 = vld [vmem:[#allocation5 + $0x1f8] sm:$0xff]   ;;  %v2021_v29 = vadd.f32 %v2020_v27, %v366_v2  ;;  %v4922_v52 = vld [vmem:[#allocation5 + $0x210] sm:$0xff]  }
 0x166   :  { %5019 = vpow2.f32 %v4504_v38  ;;  %3959 = vmatprep.mubr.bf16.mxu1 %v2553_v37  ;;  %v4923_v2 = vld [vmem:[#allocation5 + $0x258] sm:$0xff]  }
 0x167   :  { %3960 = vmatmul.mubr.bf16.vlgmr.msra.gmra.mrb[32].mxu1 %v2552_v33  ;;  %v2597_v33 = vpop.permute.xlu1 %2596 }
 0x168   :  { %4724 = vmatpush3.bf16.msra.mxu0 %v4900_v42  ;;  %4732 = vmatpush3.bf16.msra.mxu1 %v4902_v43 }
 0x169   :  { %4733 = vmatprep.subr.bf16.mxu1 %v4903_v45  ;;  %4753 = vmatprep.subr.bf16.mxu0 %v4917_v47  ;;  %v4933_v47 = vld [vmem:[#allocation5 + $0x2c0] sm:$0xff]  }
 0x16c   :  { %4734 = vmatpush3.bf16.msra.mxu1 %v4904_v48 }
 0x16d   :  { %v5014_v51 = vpop.eup %5013  ;;  %4735 = vmatprep.subr.bf16.mxu1 %v4905_v49 }
 0x16e   :  { %v5016_v53 = vpop.eup %5015  ;;  %v2566_v54 = vadd.f32 1.0, %v5014_v51 }
 0x16f   :  { %v5018_v56 = vpop.eup %5017  ;;  %v2567_v57 = vadd.f32 1.0, %v5016_v53 }
 0x170   :  { %v5020_v58 = vpop.eup %5019  ;;  %5021 = vrcp.f32 %v2566_v54  ;;  %v2568_v60 = vadd.f32 1.0, %v5018_v56  ;;  %4736 = vmatpush3.bf16.msra.mxu1 %v4906_v50 }
 0x171   :  { %5023 = vrcp.f32 %v2567_v57  ;;  %v2569_v9 = vadd.f32 1.0, %v5020_v58  ;;  %4737 = vmatprep.subr.bf16.mxu1 %v4907_v59  ;;  %v4918_v58 = vld [vmem:[#allocation5 + $0x200] sm:$0xff]  }
 0x172   :  { %5025 = vrcp.f32 %v2568_v60 }
 0x173   :  { %5027 = vrcp.f32 %v2569_v9 }
 0x174   :  { %4738 = vmatpush3.bf16.msra.mxu1 %v4908_v61  ;;  %v4919_v61 = vld [vmem:[#allocation5 + $0x248] sm:$0xff]  }
 0x175   :  { %4739 = vmatprep.subr.bf16.mxu1 %v4909_v41  ;;  %v4920_v41 = vld [vmem:[#allocation5 + $0x208] sm:$0xff]  }
 0x178   :  { %4740 = vmatpush3.bf16.msra.mxu1 %v4910_v62  ;;  %v4921_v62 = vld [vmem:[#allocation5 + $0x250] sm:$0xff]  }
 0x179   :  { %4741 = vmatprep.subr.bf16.mxu1 %v4911_v1 }
 0x17a   :  { %v5022_v55 = vpop.eup %5021 }
 0x17b   :  { %v5024_v11 = vpop.eup %5023  ;;  %v2578_v12 = vmul.f32 %v5022_v55, %v5446_v35 }
 0x17c   :  { %v5026_v17 = vpop.eup %5025  ;;  %v2579_v40 = vmul.f32 %v5024_v11, %v5448_v18  ;;  %4742 = vmatpush3.bf16.msra.mxu1 %v4912_v3 }
 0x17d   :  { %v5028_v20 = vpop.eup %5027  ;;  %v2580_v21 = vmul.f32 %v5026_v17, %v5451_v8  ;;  %v2582_v24 = vmul.f32 %v2578_v12, %v2015_v4  ;;  %4743 = vmatprep.subr.bf16.mxu1 %v4913_v7  ;;  %v4916_v8 = vld [vmem:[#allocation5 + $0x1b8] sm:$0xff]   ;;  %v4926_v17 = vld [vmem:[#allocation5 + $0x220] sm:$0xff]  }
 0x17e   :  { %v2581_v35 = vmul.f32 %v5028_v20, %v5454_v32  ;;  %v2583_v28 = vmul.f32 %v2579_v40, %v2017_v0  ;;  %v2057_v30 = vpop.f32.mrb[12].mxu0  ;;  %v4924_v12 = vld [vmem:[#allocation5 + $0x218] sm:$0xff]   ;;  %v378_v40 = vrot.slane %v5435_v31, %v5423_v46  ;;  %v5489_v20 = vld [vmem:[%s5605_s5 + $0x10] sm:$0xff] }
 0x17f   :  { %v2584_v34 = vmul.f32 %v2580_v21, %v2019_v14  ;;  %v5470_v18 = vadd.f32 %v2057_v30, %v370_v16  ;;  %v2059_v36 = vpop.f32.mrb[13].mxu0  ;;  %v2599_v42 = vmul.f32 %v2592_v26, %v2582_v24  ;;  %v4928_v21 = vld [vmem:[#allocation5 + $0x228] sm:$0xff]  }
 0x180   :  { %v2585_v37 = vmul.f32 %v2581_v35, %v2021_v29  ;;  %v5472_v38 = vadd.f32 %v2059_v36, %v374_v19  ;;  %v2061_v39 = vpop.f32.mrb[14].mxu0  ;;  %4744 = vmatpush3.bf16.msra.mxu1 %v4914_v63  ;;  %v2600_v27 = vmul.f32 %v2592_v26, %v2583_v28  ;;  %v2100_v53 = vpop.f32.mrb[12].mxu1  ;;  %v382_v63 = vrot.slane %v5435_v31, %v5426_v6  ;;  %v4929_v26 = vld [vmem:[#allocation5 + $0x270] sm:$0xff]  }
 0x181   :  { %v4507_v43 = vmul.f32 -1.442695, %v5470_v18  ;;  %v2601_v44 = vmul.f32 %v2597_v33, %v2584_v34  ;;  %v5475_v45 = vadd.f32 %v2061_v39, %v370_v16  ;;  %v2063_v32 = vpop.f32.mrb[15].mxu0  ;;  %4745 = vmatprep.subr.bf16.mxu1 %v4915_v23  ;;  %v2102_v57 = vpop.f32.mrb[13].mxu1  ;;  %v4925_v16 = vld [vmem:[#allocation5 + $0x260] sm:$0xff]   ;;  %v2101_v24 = vadd.f32 %v2100_v53, %v378_v40 }
 0x182   :  { %v4508_v48 = vmul.f32 -1.442695, %v5472_v38  ;;  %v2602_v49 = vmul.f32 %v2597_v33, %v2585_v37  ;;  %v5478_v50 = vadd.f32 %v2063_v32, %v374_v19  ;;  %v2104_v60 = vpop.f32.mrb[14].mxu1  ;;  %v4927_v19 = vld [vmem:[#allocation5 + $0x268] sm:$0xff]   ;;  %v2103_v35 = vadd.f32 %v2102_v57, %v382_v63  ;;  %v4930_v37 = vld [vmem:[#allocation5 + $0x230] sm:$0xff]  }
 0x183   :  { %5029 = vpow2.f32 %v4507_v43  ;;  %v2603_v51 = vpack.c.bf16 %v2601_v44, %v2599_v42  ;;  %v4509_v59 = vmul.f32 -1.442695, %v5475_v45  ;;  %v2106_v9 = vpop.f32.mrb[15].mxu1  ;;  %v2105_v30 = vadd.f32 %v2104_v60, %v378_v40  ;;  %v2643_v43 = vpop.permute.xlu0 %2642  ;;  %v4931_v44 = vld [vmem:[#allocation5 + $0x278] sm:$0xff]   ;;  %v4938_v40 = vld [vmem:[#allocation5 + $0x290] sm:$0xff]  }
 0x184   :  { %5031 = vpow2.f32 %v4508_v48  ;;  %v2604_v54 = vpack.c.bf16 %v2602_v49, %v2600_v27  ;;  %v4510_v56 = vmul.f32 -1.442695, %v5478_v50  ;;  %4746 = vmatpush3.bf16.msra.mxu1 %v4916_v8  ;;  %v386_v33 = vrot.slane %v5489_v20, %v5344_v5  ;;  %v2648_v48 = vpop.permute.xlu1 %2647 }
 0x185   :  { %5033 = vpow2.f32 %v4509_v59  ;;  %4775 = vmatprep.subr.bf16.mxu1 %v4933_v47  ;;  %v390_v36 = vrot.slane %v5489_v20, %v5352_v10  ;;  %v2107_v47 = vadd.f32 %v2106_v9, %v382_v63  ;;  %v4939_v63 = vld [vmem:[#allocation5 + $0x2d8] sm:$0xff]  }
 0x186   :  { %5035 = vpow2.f32 %v4510_v56  ;;  %4000 = vmatprep.mubr.bf16.mxu0 %v2604_v54 }
 0x187   :  { %4001 = vmatmul.mubr.bf16.vlgmr.msra.gmra.mrb[36].mxu0 %v2603_v51 }
 0x188   :  { %4754 = vmatpush3.bf16.msra.mxu0 %v4918_v58 }
 0x189   :  { %4755 = vmatprep.subr.bf16.mxu0 %v4919_v61  ;;  %v4949_v61 = vld [vmem:[#allocation5 + $0x340] sm:$0xff]  }
 0x18c   :  { %4756 = vmatpush3.bf16.msra.mxu0 %v4920_v41 }
 0x18d   :  { %v5030_v1 = vpop.eup %5029  ;;  %4757 = vmatprep.subr.bf16.mxu0 %v4921_v62 }
 0x18e   :  { %v5032_v3 = vpop.eup %5031  ;;  %v2617_v4 = vadd.f32 1.0, %v5030_v1 }
 0x18f   :  { %v5034_v7 = vpop.eup %5033  ;;  %v2618_v55 = vadd.f32 1.0, %v5032_v3 }
 0x190   :  { %v5036_v0 = vpop.eup %5035  ;;  %5037 = vrcp.f32 %v2617_v4  ;;  %v2619_v11 = vadd.f32 1.0, %v5034_v7  ;;  %4758 = vmatpush3.bf16.msra.mxu0 %v4922_v52 }
 0x191   :  { %5039 = vrcp.f32 %v2618_v55  ;;  %v2620_v14 = vadd.f32 1.0, %v5036_v0  ;;  %4759 = vmatprep.subr.bf16.mxu0 %v4923_v2  ;;  %v4934_v0 = vld [vmem:[#allocation5 + $0x280] sm:$0xff]  }
 0x192   :  { %5041 = vrcp.f32 %v2619_v11 }
 0x193   :  { %5043 = vrcp.f32 %v2620_v14 }
 0x194   :  { %4760 = vmatpush3.bf16.msra.mxu0 %v4924_v12  ;;  %v4935_v12 = vld [vmem:[#allocation5 + $0x2c8] sm:$0xff]  }
 0x195   :  { %4761 = vmatprep.subr.bf16.mxu0 %v4925_v16  ;;  %v4936_v16 = vld [vmem:[#allocation5 + $0x288] sm:$0xff]  }
 0x198   :  { %4762 = vmatpush3.bf16.msra.mxu0 %v4926_v17  ;;  %v4937_v17 = vld [vmem:[#allocation5 + $0x2d0] sm:$0xff]  }
 0x199   :  { %4763 = vmatprep.subr.bf16.mxu0 %v4927_v19 }
 0x19a   :  { %v5038_v23 = vpop.eup %5037 }
 0x19b   :  { %v5040_v28 = vpop.eup %5039  ;;  %v2629_v29 = vmul.f32 %v5038_v23, %v5470_v18 }
 0x19c   :  { %v5042_v31 = vpop.eup %5041  ;;  %v2630_v34 = vmul.f32 %v5040_v28, %v5472_v38  ;;  %4764 = vmatpush3.bf16.msra.mxu0 %v4928_v21 }
 0x19d   :  { %v5044_v39 = vpop.eup %5043  ;;  %v2631_v8 = vmul.f32 %v5042_v31, %v5475_v45  ;;  %v2633_v42 = vmul.f32 %v2629_v29, %v2101_v24  ;;  %4765 = vmatprep.subr.bf16.mxu0 %v4929_v26  ;;  %v4932_v45 = vld [vmem:[#allocation5 + $0x238] sm:$0xff]   ;;  %v4942_v31 = vld [vmem:[#allocation5 + $0x2a0] sm:$0xff]  }
 0x19e   :  { %v2632_v18 = vmul.f32 %v5044_v39, %v5478_v50  ;;  %v2634_v32 = vmul.f32 %v2630_v34, %v2103_v35  ;;  %v2143_v27 = vpop.f32.mrb[16].mxu0  ;;  %v4940_v29 = vld [vmem:[#allocation5 + $0x298] sm:$0xff]   ;;  %v394_v34 = vrot.slane %v5489_v20, %v5381_v13  ;;  %v4944_v39 = vld [vmem:[#allocation5 + $0x2a8] sm:$0xff]  }
 0x19f   :  { %v2635_v49 = vmul.f32 %v2631_v8, %v2105_v30  ;;  %v5499_v38 = vadd.f32 %v2143_v27, %v386_v33  ;;  %v2145_v51 = vpop.f32.mrb[17].mxu0  ;;  %v2650_v56 = vmul.f32 %v2643_v43, %v2633_v42  ;;  %v4945_v42 = vld [vmem:[#allocation5 + $0x2f0] sm:$0xff]   ;;  %v402_v27 = vrot.slane %v5489_v20, %v5391_v22 }
 0x1a0   :  { %v2636_v59 = vmul.f32 %v2632_v18, %v2107_v47  ;;  %v5501_v53 = vadd.f32 %v2145_v51, %v390_v36  ;;  %v2147_v54 = vpop.f32.mrb[18].mxu0  ;;  %4766 = vmatpush3.bf16.msra.mxu0 %v4930_v37  ;;  %v2651_v9 = vmul.f32 %v2643_v43, %v2634_v32  ;;  %v2186_v3 = vpop.f32.mrb[16].mxu1  ;;  %v398_v37 = vrot.slane %v5489_v20, %v5384_v15 }
 0x1a1   :  { %v4513_v57 = vmul.f32 -1.442695, %v5499_v38  ;;  %v2652_v58 = vmul.f32 %v2648_v48, %v2635_v49  ;;  %v5504_v60 = vadd.f32 %v2147_v54, %v386_v33  ;;  %v2149_v50 = vpop.f32.mrb[19].mxu0  ;;  %4767 = vmatprep.subr.bf16.mxu0 %v4931_v44  ;;  %v2188_v55 = vpop.f32.mrb[17].mxu1  ;;  %v4941_v33 = vld [vmem:[#allocation5 + $0x2e0] sm:$0xff]   ;;  %v2187_v8 = vadd.f32 %v2186_v3, %v394_v34 }
 0x1a2   :  { %v4514_v41 = vmul.f32 -1.442695, %v5501_v53  ;;  %v2653_v62 = vmul.f32 %v2648_v48, %v2636_v59  ;;  %v5507_v52 = vadd.f32 %v2149_v50, %v390_v36  ;;  %v2190_v11 = vpop.f32.mrb[18].mxu1  ;;  %v4943_v36 = vld [vmem:[#allocation5 + $0x2e8] sm:$0xff]   ;;  %v2189_v44 = vadd.f32 %v2188_v55, %v398_v37  ;;  %v4946_v59 = vld [vmem:[#allocation5 + $0x2b0] sm:$0xff]  }
 0x1a3   :  { %5045 = vpow2.f32 %v4513_v57  ;;  %v2654_v1 = vpack.c.bf16 %v2652_v58, %v2650_v56  ;;  %v4515_v2 = vmul.f32 -1.442695, %v5504_v60  ;;  %v2192_v14 = vpop.f32.mrb[19].mxu1  ;;  %v2191_v47 = vadd.f32 %v2190_v11, %v394_v34  ;;  %v4947_v57 = vld [vmem:[#allocation5 + $0x2f8] sm:$0xff]   ;;  %v4954_v34 = vld [vmem:[#allocation5 + $0x310] sm:$0xff]  }
 0x1a4   :  { %5047 = vpow2.f32 %v4514_v41  ;;  %v2655_v4 = vpack.c.bf16 %v2653_v62, %v2651_v9  ;;  %v4516_v7 = vmul.f32 -1.442695, %v5507_v52  ;;  %4768 = vmatpush3.bf16.msra.mxu0 %v4932_v45  ;;  %v406_v51 = vrot.slane %v5489_v20, %v5394_v25  ;;  %v2694_v9 = vpop.permute.xlu0 %2693 }
 0x1a5   :  { %5049 = vpow2.f32 %v4515_v2  ;;  %4797 = vmatprep.subr.bf16.mxu0 %v4949_v61  ;;  %v2193_v50 = vadd.f32 %v2192_v14, %v398_v37  ;;  %v4955_v37 = vld [vmem:[#allocation5 + $0x358] sm:$0xff]  }
 0x1a6   :  { %5051 = vpow2.f32 %v4516_v7  ;;  %4041 = vmatprep.mubr.bf16.mxu1 %v2655_v4 }
 0x1a7   :  { %4042 = vmatmul.mubr.bf16.vlgmr.msra.gmra.mrb[36].mxu1 %v2654_v1  ;;  %v2699_v1 = vpop.permute.xlu1 %2698 }
 0x1a8   :  { %4776 = vmatpush3.bf16.msra.mxu1 %v4934_v0 }
 0x1a9   :  { %4777 = vmatprep.subr.bf16.mxu1 %v4935_v12  ;;  %v4965_v12 = vld [vmem:[#allocation5 + $0x3c0] sm:$0xff]  }
 0x1ac   :  { %4778 = vmatpush3.bf16.msra.mxu1 %v4936_v16 }
 0x1ad   :  { %v5046_v19 = vpop.eup %5045  ;;  %4779 = vmatprep.subr.bf16.mxu1 %v4937_v17 }
 0x1ae   :  { %v5048_v21 = vpop.eup %5047  ;;  %v2668_v24 = vadd.f32 1.0, %v5046_v19 }
 0x1af   :  { %v5050_v26 = vpop.eup %5049  ;;  %v2669_v23 = vadd.f32 1.0, %v5048_v21 }
 0x1b0   :  { %v5052_v35 = vpop.eup %5051  ;;  %5053 = vrcp.f32 %v2668_v24  ;;  %v2670_v28 = vadd.f32 1.0, %v5050_v26  ;;  %4780 = vmatpush3.bf16.msra.mxu1 %v4938_v40 }
 0x1b1   :  { %5055 = vrcp.f32 %v2669_v23  ;;  %v2671_v30 = vadd.f32 1.0, %v5052_v35  ;;  %4781 = vmatprep.subr.bf16.mxu1 %v4939_v63  ;;  %v4950_v35 = vld [vmem:[#allocation5 + $0x300] sm:$0xff]  }
 0x1b2   :  { %5057 = vrcp.f32 %v2670_v28 }
 0x1b3   :  { %5059 = vrcp.f32 %v2671_v30 }
 0x1b4   :  { %4782 = vmatpush3.bf16.msra.mxu1 %v4940_v29  ;;  %v4951_v29 = vld [vmem:[#allocation5 + $0x348] sm:$0xff]  }
 0x1b5   :  { %4783 = vmatprep.subr.bf16.mxu1 %v4941_v33  ;;  %v4952_v33 = vld [vmem:[#allocation5 + $0x308] sm:$0xff]  }
 0x1b8   :  { %4784 = vmatpush3.bf16.msra.mxu1 %v4942_v31  ;;  %v4953_v31 = vld [vmem:[#allocation5 + $0x350] sm:$0xff]  }
 0x1b9   :  { %4785 = vmatprep.subr.bf16.mxu1 %v4943_v36 }
 0x1ba   :  { %v5054_v43 = vpop.eup %5053 }
 0x1bb   :  { %v5056_v18 = vpop.eup %5055  ;;  %v2680_v32 = vmul.f32 %v5054_v43, %v5499_v38 }
 0x1bc   :  { %v5058_v48 = vpop.eup %5057  ;;  %v2681_v49 = vmul.f32 %v5056_v18, %v5501_v53  ;;  %4786 = vmatpush3.bf16.msra.mxu1 %v4944_v39 }
 0x1bd   :  { %v5060_v54 = vpop.eup %5059  ;;  %v2682_v45 = vmul.f32 %v5058_v48, %v5504_v60  ;;  %v2684_v56 = vmul.f32 %v2680_v32, %v2187_v8  ;;  %4787 = vmatprep.subr.bf16.mxu1 %v4945_v42  ;;  %v4948_v60 = vld [vmem:[#allocation5 + $0x2b8] sm:$0xff]   ;;  %v4958_v48 = vld [vmem:[#allocation5 + $0x320] sm:$0xff]  }
 0x1be   :  { %v2683_v38 = vmul.f32 %v5060_v54, %v5507_v52  ;;  %v2685_v58 = vmul.f32 %v2681_v49, %v2189_v44  ;;  %v2229_v61 = vpop.f32.mrb[20].mxu0  ;;  %v4956_v32 = vld [vmem:[#allocation5 + $0x318] sm:$0xff]   ;;  %v410_v49 = vrot.slane %v5489_v20, %v5423_v46 }
 0x1bf   :  { %v2686_v41 = vmul.f32 %v2682_v45, %v2191_v47  ;;  %v5523_v62 = vadd.f32 %v2229_v61, %v402_v27  ;;  %v2231_v53 = vpop.f32.mrb[21].mxu0  ;;  %v2701_v7 = vmul.f32 %v2694_v9, %v2684_v56  ;;  %v5542_v54 = vld [vmem:[%s5605_s5 + $0x18] sm:$0xff]  ;;  %v4960_v45 = vld [vmem:[#allocation5 + $0x328] sm:$0xff]  }
 0x1c0   :  { %v2687_v2 = vmul.f32 %v2683_v38, %v2193_v50  ;;  %v5525_v3 = vadd.f32 %v2231_v53, %v406_v51  ;;  %v2233_v4 = vpop.f32.mrb[22].mxu0  ;;  %4788 = vmatpush3.bf16.msra.mxu1 %v4946_v59  ;;  %v2702_v14 = vmul.f32 %v2694_v9, %v2685_v58  ;;  %v2272_v21 = vpop.f32.mrb[20].mxu1  ;;  %v414_v59 = vrot.slane %v5489_v20, %v5426_v6 }
 0x1c1   :  { %v2703_v55 = vmul.f32 %v2699_v1, %v2686_v41  ;;  %v4519_v0 = vmul.f32 -1.442695, %v5523_v62  ;;  %v5528_v52 = vadd.f32 %v2233_v4, %v402_v27  ;;  %v2235_v11 = vpop.f32.mrb[23].mxu0  ;;  %4789 = vmatprep.subr.bf16.mxu1 %v4947_v57  ;;  %v2274_v23 = vpop.f32.mrb[21].mxu1  ;;  %v4957_v27 = vld [vmem:[#allocation5 + $0x360] sm:$0xff]   ;;  %v2273_v56 = vadd.f32 %v2272_v21, %v410_v49  ;;  %v4961_v57 = vld [vmem:[#allocation5 + $0x370] sm:$0xff]  }
 0x1c2   :  { %v2704_v16 = vmul.f32 %v2699_v1, %v2687_v2  ;;  %v4520_v17 = vmul.f32 -1.442695, %v5525_v3  ;;  %v5531_v40 = vadd.f32 %v2235_v11, %v406_v51  ;;  %v2276_v28 = vpop.f32.mrb[22].mxu1  ;;  %v4959_v51 = vld [vmem:[#allocation5 + $0x368] sm:$0xff]   ;;  %v2275_v58 = vadd.f32 %v2274_v23, %v414_v59  ;;  %v4962_v2 = vld [vmem:[#allocation5 + $0x330] sm:$0xff]  }
 0x1c3   :  { %v2705_v19 = vpack.c.bf16 %v2703_v55, %v2701_v7  ;;  %5061 = vpow2.f32 %v4519_v0  ;;  %v4521_v63 = vmul.f32 -1.442695, %v5528_v52  ;;  %v2278_v30 = vpop.f32.mrb[23].mxu1  ;;  %v2277_v9 = vadd.f32 %v2276_v28, %v410_v49  ;;  %v4963_v55 = vld [vmem:[#allocation5 + $0x378] sm:$0xff]  }
 0x1c4   :  { %5063 = vpow2.f32 %v4520_v17  ;;  %v4522_v24 = vmul.f32 -1.442695, %v5531_v40  ;;  %v2706_v26 = vpack.c.bf16 %v2704_v16, %v2702_v14  ;;  %4790 = vmatpush3.bf16.msra.mxu1 %v4948_v60  ;;  %v418_v41 = vrot.slane %v5542_v54, %v5344_v5  ;;  %v2745_v5 = vpop.permute.xlu0 %2744  ;;  %v2750_v17 = vpop.permute.xlu1 %2749 }
 0x1c5   :  { %5065 = vpow2.f32 %v4521_v63  ;;  %4819 = vmatprep.subr.bf16.mxu1 %v4965_v12  ;;  %v422_v1 = vrot.slane %v5542_v54, %v5352_v10  ;;  %v2279_v11 = vadd.f32 %v2278_v30, %v414_v59 }
 0x1c6   :  { %5067 = vpow2.f32 %v4522_v24  ;;  %4082 = vmatprep.mubr.bf16.mxu0 %v2706_v26 }
 0x1c7   :  { %4083 = vmatmul.mubr.bf16.vlgmr.msra.gmra.mrb[40].mxu0 %v2705_v19 }
 0x1c8   :  { %4798 = vmatpush3.bf16.msra.mxu0 %v4950_v35 }
 0x1c9   :  { %4799 = vmatprep.subr.bf16.mxu0 %v4951_v29 }
 0x1cc   :  { %4800 = vmatpush3.bf16.msra.mxu0 %v4952_v33 }
 0x1cd   :  { %v5062_v36 = vpop.eup %5061  ;;  %4801 = vmatprep.subr.bf16.mxu0 %v4953_v31 }
 0x1ce   :  { %v5064_v39 = vpop.eup %5063  ;;  %v2719_v8 = vadd.f32 1.0, %v5062_v36 }
 0x1cf   :  { %v5066_v42 = vpop.eup %5065  ;;  %v2720_v43 = vadd.f32 1.0, %v5064_v39 }
 0x1d0   :  { %v5068_v44 = vpop.eup %5067  ;;  %5069 = vrcp.f32 %v2719_v8  ;;  %v2721_v18 = vadd.f32 1.0, %v5066_v42  ;;  %4802 = vmatpush3.bf16.msra.mxu0 %v4954_v34  ;;  %v4966_v8 = vld [vmem:[#allocation5 + $0x380] sm:$0xff]  }
 0x1d1   :  { %5071 = vrcp.f32 %v2720_v43  ;;  %v2722_v47 = vadd.f32 1.0, %v5068_v44  ;;  %4803 = vmatprep.subr.bf16.mxu0 %v4955_v37  ;;  %v4967_v43 = vld [vmem:[#allocation5 + $0x3c8] sm:$0xff]  }
 0x1d2   :  { %5073 = vrcp.f32 %v2721_v18  ;;  %v4968_v18 = vld [vmem:[#allocation5 + $0x388] sm:$0xff]  }
 0x1d3   :  { %5075 = vrcp.f32 %v2722_v47  ;;  %v4970_v47 = vld [vmem:[#allocation5 + $0x390] sm:$0xff]  }
 0x1d4   :  { %4804 = vmatpush3.bf16.msra.mxu0 %v4956_v32  ;;  %v4969_v32 = vld [vmem:[#allocation5 + $0x3d0] sm:$0xff]  }
 0x1d5   :  { %4805 = vmatprep.subr.bf16.mxu0 %v4957_v27 }
 0x1d8   :  { %4806 = vmatpush3.bf16.msra.mxu0 %v4958_v48  ;;  %v4971_v48 = vld [vmem:[#allocation5 + $0x3d8] sm:$0xff]  }
 0x1d9   :  { %4807 = vmatprep.subr.bf16.mxu0 %v4959_v51 }
 0x1da   :  { %v5070_v38 = vpop.eup %5069 }
 0x1db   :  { %v5072_v50 = vpop.eup %5071  ;;  %v2731_v61 = vmul.f32 %v5070_v38, %v5523_v62  ;;  %v4972_v38 = vld [vmem:[#allocation5 + $0x398] sm:$0xff]  }
 0x1dc   :  { %v5074_v20 = vpop.eup %5073  ;;  %v2732_v53 = vmul.f32 %v5072_v50, %v5525_v3  ;;  %4808 = vmatpush3.bf16.msra.mxu0 %v4960_v45  ;;  %v4973_v50 = vld [vmem:[#allocation5 + $0x3e0] sm:$0xff]  }
 0x1dd   :  { %v5076_v4 = vpop.eup %5075  ;;  %v2733_v60 = vmul.f32 %v5074_v20, %v5528_v52  ;;  %v2735_v7 = vmul.f32 %v2731_v61, %v2273_v56  ;;  %4809 = vmatprep.subr.bf16.mxu0 %v4961_v57  ;;  %v4964_v52 = vld [vmem:[#allocation5 + $0x338] sm:$0xff]   ;;  %v4974_v61 = vld [vmem:[#allocation5 + $0x3a0] sm:$0xff]   ;;  %v430_v20 = vrot.slane %v5542_v54, %v5384_v15  ;;  %v438_v15 = vrot.slane %v5542_v54, %v5394_v25 }
 0x1de   :  { %v2734_v62 = vmul.f32 %v5076_v4, %v5531_v40  ;;  %v2736_v0 = vmul.f32 %v2732_v53, %v2275_v58  ;;  %v2315_v12 = vpop.f32.mrb[24].mxu0  ;;  %v4976_v53 = vld [vmem:[#allocation5 + $0x3a8] sm:$0xff]  }
 0x1df   :  { %v2737_v14 = vmul.f32 %v2733_v60, %v2277_v9  ;;  %v5552_v16 = vadd.f32 %v2315_v12, %v418_v41  ;;  %v2317_v3 = vpop.f32.mrb[25].mxu0  ;;  %v2752_v21 = vmul.f32 %v2745_v5, %v2735_v7  ;;  %v426_v9 = vrot.slane %v5542_v54, %v5381_v13  ;;  %v4978_v12 = vld [vmem:[#allocation5 + $0x3b0] sm:$0xff]  }
 0x1e0   :  { %v2738_v10 = vmul.f32 %v2734_v62, %v2279_v11  ;;  %v5554_v19 = vadd.f32 %v2317_v3, %v422_v1  ;;  %v2319_v63 = vpop.f32.mrb[26].mxu0  ;;  %4810 = vmatpush3.bf16.msra.mxu0 %v4962_v2  ;;  %v2753_v35 = vmul.f32 %v2745_v5, %v2736_v0  ;;  %v2358_v34 = vpop.f32.mrb[24].mxu1  ;;  %v4977_v2 = vld [vmem:[#allocation5 + $0x3f0] sm:$0xff]   ;;  %v434_v0 = vrot.slane %v5542_v54, %v5391_v22 }
 0x1e1   :  { %v2754_v24 = vmul.f32 %v2750_v17, %v2737_v14  ;;  %v4525_v26 = vmul.f32 -1.442695, %v5552_v16  ;;  %v5557_v40 = vadd.f32 %v2319_v63, %v418_v41  ;;  %v2321_v23 = vpop.f32.mrb[27].mxu0  ;;  %4811 = vmatprep.subr.bf16.mxu0 %v4963_v55  ;;  %v2360_v39 = vpop.f32.mrb[25].mxu1  ;;  %v4975_v41 = vld [vmem:[#allocation5 + $0x3e8] sm:$0xff]  }
 0x1e2   :  { %v2755_v28 = vmul.f32 %v2750_v17, %v2738_v10  ;;  %v4526_v29 = vmul.f32 -1.442695, %v5554_v19  ;;  %v5560_v30 = vadd.f32 %v2321_v23, %v422_v1  ;;  %v2362_v42 = vpop.f32.mrb[26].mxu1  ;;  %v2359_v1 = vadd.f32 %v2358_v34, %v426_v9  ;;  %v4979_v17 = vld [vmem:[#allocation5 + $0x3f8] sm:$0xff]   ;;  %v2796_v22 = vpop.permute.xlu0 %2795 }
 0x1e3   :  { %v2756_v33 = vpack.c.bf16 %v2754_v24, %v2752_v21  ;;  %5077 = vpow2.f32 %v4525_v26  ;;  %v4527_v31 = vmul.f32 -1.442695, %v5557_v40  ;;  %v2364_v44 = vpop.f32.mrb[27].mxu1  ;;  %v2361_v60 = vadd.f32 %v2360_v39, %v430_v20  ;;  %v2801_v26 = vpop.permute.xlu1 %2800 }
 0x1e4   :  { %5079 = vpow2.f32 %v4526_v29  ;;  %v4528_v36 = vmul.f32 -1.442695, %v5560_v30  ;;  %v2757_v37 = vpack.c.bf16 %v2755_v28, %v2753_v35  ;;  %4812 = vmatpush3.bf16.msra.mxu0 %v4964_v52  ;;  %v2363_v62 = vadd.f32 %v2362_v42, %v426_v9  ;;  %v4980_v28 = vld [vmem:[#allocation5 + $0x3b8] sm:$0xff]  }
 0x1e5   :  { %5081 = vpow2.f32 %v4527_v31  ;;  %v2365_v63 = vadd.f32 %v2364_v44, %v430_v20 }
 0x1e6   :  { %5083 = vpow2.f32 %v4528_v36  ;;  %4123 = vmatprep.mubr.bf16.mxu1 %v2757_v37 }
 0x1e7   :  { %4124 = vmatmul.mubr.bf16.vlgmr.msra.gmra.mrb[40].mxu1 %v2756_v33 }
 0x1e8   :  { %4820 = vmatpush3.bf16.msra.mxu1 %v4966_v8 }
 0x1e9   :  { %4821 = vmatprep.subr.bf16.mxu1 %v4967_v43 }
 0x1ec   :  { %4822 = vmatpush3.bf16.msra.mxu1 %v4968_v18 }
 0x1ed   :  { %v5078_v27 = vpop.eup %5077  ;;  %4823 = vmatprep.subr.bf16.mxu1 %v4969_v32 }
 0x1ee   :  { %v5080_v49 = vpop.eup %5079  ;;  %v2770_v51 = vadd.f32 1.0, %v5078_v27 }
 0x1ef   :  { %v5082_v59 = vpop.eup %5081  ;;  %v2771_v45 = vadd.f32 1.0, %v5080_v49 }
 0x1f0   :  { %v5084_v56 = vpop.eup %5083  ;;  %5085 = vrcp.f32 %v2770_v51  ;;  %v2772_v57 = vadd.f32 1.0, %v5082_v59  ;;  %4824 = vmatpush3.bf16.msra.mxu1 %v4970_v47 }
 0x1f1   :  { %5087 = vrcp.f32 %v2771_v45  ;;  %v2773_v58 = vadd.f32 1.0, %v5084_v56  ;;  %4825 = vmatprep.subr.bf16.mxu1 %v4971_v48 }
 0x1f2   :  { %5089 = vrcp.f32 %v2772_v57 }
 0x1f3   :  { %5091 = vrcp.f32 %v2773_v58  ;;  %v442_v58 = vrot.slane %v5542_v54, %v5423_v46 }
 0x1f4   :  { %4826 = vmatpush3.bf16.msra.mxu1 %v4972_v38 }
 0x1f5   :  { %4827 = vmatprep.subr.bf16.mxu1 %v4973_v50  ;;  %v446_v50 = vrot.slane %v5542_v54, %v5426_v6 }
 0x1f8   :  { %4828 = vmatpush3.bf16.msra.mxu1 %v4974_v61 }
 0x1f9   :  { %4829 = vmatprep.subr.bf16.mxu1 %v4975_v41 }
 0x1fa   :  { %v5086_v4 = vpop.eup %5085 }
 0x1fb   :  { %v5088_v7 = vpop.eup %5087  ;;  %v2782_v55 = vmul.f32 %v5086_v4, %v5552_v16 }
 0x1fc   :  { %v5090_v13 = vpop.eup %5089  ;;  %v2783_v11 = vmul.f32 %v5088_v7, %v5554_v19  ;;  %4830 = vmatpush3.bf16.msra.mxu1 %v4976_v53 }
 0x1fd   :  { %v5092_v5 = vpop.eup %5091  ;;  %v2784_v14 = vmul.f32 %v5090_v13, %v5557_v40  ;;  %v2786_v3 = vmul.f32 %v2782_v55, %v2359_v1  ;;  %4831 = vmatprep.subr.bf16.mxu1 %v4977_v2 }
 0x1fe   :  { %v2785_v16 = vmul.f32 %v5092_v5, %v5560_v30  ;;  %v2787_v10 = vmul.f32 %v2783_v11, %v2361_v60  ;;  %v2401_v52 = vpop.f32.mrb[28].mxu0  ;;  %v2852_v5 = vpop.permute.xlu1 %2851 }
 0x1ff   :  { %v2788_v21 = vmul.f32 %v2784_v14, %v2363_v62  ;;  %v2402_v24 = vadd.f32 %v2401_v52, %v434_v0  ;;  %v2403_v19 = vpop.f32.mrb[29].mxu0  ;;  %v2803_v29 = vmul.f32 %v2796_v22, %v2786_v3 }
 0x200   :  { %v2789_v23 = vmul.f32 %v2785_v16, %v2365_v63  ;;  %v2404_v25 = vadd.f32 %v2403_v19, %v438_v15  ;;  %v2405_v35 = vpop.f32.mrb[30].mxu0  ;;  %4832 = vmatpush3.bf16.msra.mxu1 %v4978_v12  ;;  %v2804_v30 = vmul.f32 %v2796_v22, %v2787_v10  ;;  %v2444_v43 = vpop.f32.mrb[28].mxu1 }
 0x201   :  { %v2805_v40 = vmul.f32 %v2801_v26, %v2788_v21  ;;  %v4531_v33 = vmul.f32 -1.442695, %v2402_v24  ;;  %v2406_v31 = vadd.f32 %v2405_v35, %v434_v0  ;;  %v2407_v34 = vpop.f32.mrb[31].mxu0  ;;  %4833 = vmatprep.subr.bf16.mxu1 %v4979_v17  ;;  %v2446_v32 = vpop.f32.mrb[29].mxu1  ;;  %v2445_v61 = vadd.f32 %v2444_v43, %v442_v58 }
 0x202   :  { %v2806_v36 = vmul.f32 %v2801_v26, %v2789_v23  ;;  %v4532_v37 = vmul.f32 -1.442695, %v2404_v25  ;;  %v2408_v39 = vadd.f32 %v2407_v34, %v438_v15  ;;  %v2448_v47 = vpop.f32.mrb[30].mxu1  ;;  %v2447_v41 = vadd.f32 %v2446_v32, %v446_v50  ;;  %v2847_v15 = vpop.permute.xlu0 %2846  ;;  %v3117_v26 = vld [vmem:[%s5602_s2 + $0x8] sm:$0xff] }
 0x203   :  { %v2807_v8 = vpack.c.bf16 %v2805_v40, %v2803_v29  ;;  %5093 = vpow2.f32 %v4531_v33  ;;  %v4533_v42 = vmul.f32 -1.442695, %v2406_v31  ;;  %v2450_v27 = vpop.f32.mrb[31].mxu1  ;;  %v2449_v55 = vadd.f32 %v2448_v47, %v442_v58 }
 0x204   :  { %5095 = vpow2.f32 %v4532_v37  ;;  %v4534_v44 = vmul.f32 -1.442695, %v2408_v39  ;;  %v2808_v18 = vpack.c.bf16 %v2806_v36, %v2804_v30  ;;  %4834 = vmatpush3.bf16.msra.mxu1 %v4980_v28  ;;  %v2451_v13 = vadd.f32 %v2450_v27, %v446_v50 }
 0x205   :  { %5097 = vpow2.f32 %v4533_v42 }
 0x206   :  { %5099 = vpow2.f32 %v4534_v44  ;;  %4164 = vmatprep.mubr.bf16.mxu0 %v2808_v18 }
 0x207   :  { %4165 = vmatmul.mubr.bf16.vlgmr.msra.gmra.mrb[44].mxu0 %v2807_v8 }
 0x20d   :  { %v5094_v48 = vpop.eup %5093 }
 0x20e   :  { %v5096_v49 = vpop.eup %5095  ;;  %v2821_v51 = vadd.f32 1.0, %v5094_v48 }
 0x20f   :  { %v5098_v59 = vpop.eup %5097  ;;  %v2822_v45 = vadd.f32 1.0, %v5096_v49 }
 0x210   :  { %v5100_v56 = vpop.eup %5099  ;;  %5101 = vrcp.f32 %v2821_v51  ;;  %v2823_v57 = vadd.f32 1.0, %v5098_v59 }
 0x211   :  { %5103 = vrcp.f32 %v2822_v45  ;;  %v2824_v38 = vadd.f32 1.0, %v5100_v56 }
 0x212   :  { %5105 = vrcp.f32 %v2823_v57 }
 0x213   :  { %5107 = vrcp.f32 %v2824_v38 }
 0x21a   :  { %v5102_v9 = vpop.eup %5101 }
 0x21b   :  { %v5104_v20 = vpop.eup %5103  ;;  %v2833_v53 = vmul.f32 %v5102_v9, %v2402_v24  ;;  %v3116_v24 = vld [vmem:[%s5602_s2] sm:$0xff]  ;;  %s5189_s2 = smov [#allocation7]  }
 0x21c   :  { %v5106_v1 = vpop.eup %5105  ;;  %v2834_v2 = vmul.f32 %v5104_v20, %v2404_v25  ;;  %s4221_s20 = sshll.u32 %s5189_s2, 4  ;;  %s4222_s20 = int_to_ptr.vmem [resolvable:$true] %s4221_s20 }
 0x21d   :  { %v5108_v4 = vpop.eup %5107  ;;  %v2835_v60 = vmul.f32 %v5106_v1, %v2406_v31  ;;  %v2837_v7 = vmul.f32 %v2833_v53, %v2445_v61  ;;  %s5154_s3 = scalar_lea.vmem %s4222_s20, 256  ;;  %p5159_p3 = scmp.lt.s32.totalorder %s4222_s20, %s4222_s20 }
 0x21e   :  { %v2836_v62 = vmul.f32 %v5108_v4, %v2408_v39  ;;  %v2838_v0 = vmul.f32 %v2834_v2, %v2447_v41  ;;  %v4681_v11 = vpop.f32.mrb[32].mxu0  ;;  %p5155_p2 = scmp.ne.s32.totalorder %s4222_s20, %s5154_s3  ;;  %p5160_p4 = scmp.lt.s32.totalorder %s5154_s3, %s5154_s3 }
 0x21f   :  { %v2839_v46 = vmul.f32 %v2835_v60, %v2449_v55  ;;  %v4682_v12 = vpop.f32.mrb[33].mxu0  ;;  %v2854_v3 = vmul.f32 %v2847_v15, %v2837_v7 }
 0x220   :  { %v2840_v6 = vmul.f32 %v2836_v62, %v2451_v13  ;;  %v4683_v54 = vadd.f32 %v4682_v12, %v4681_v11  ;;  %v4684_v14 = vpop.f32.mrb[34].mxu0  ;;  %v2855_v10 = vmul.f32 %v2847_v15, %v2838_v0  ;;  %p5161_p5 = por %p5160_p4, %p5159_p3 }
 0x221   :  { %v2856_v17 = vmul.f32 %v2852_v5, %v2839_v46  ;;  %v4685_v16 = vpop.f32.mrb[35].mxu0 }
 0x222   :  { %v2857_v63 = vmul.f32 %v2852_v5, %v2840_v6  ;;  %v4686_v52 = vadd.f32 %v4685_v16, %v4684_v14  ;;  %v3921_v25 = vadd.f32 %v4683_v54, %v3116_v24  ;;  %p5162_p6 = pnand %p5161_p5, %p5155_p2 }
 0x223   :  { %v2858_v22 = vpack.c.bf16 %v2856_v17, %v2854_v3 }
 0x224   :  { %v2859_v21 = vpack.c.bf16 %v2857_v63, %v2855_v10  ;;  %v3924_v40 = vadd.f32 %v4686_v52, %v3117_v26 }
 0x226   :  { %4205 = vmatprep.mubr.bf16.mxu1 %v2859_v21 }
 0x227   :  { %4206 = vmatmul.mubr.bf16.vlgmr.msra.gmra.mrb[44].mxu1 %v2858_v22 }
 0x23a   :  { %v4703_v19 = vpop.f32.mrb[32].mxu1 }
 0x23b   :  { %v4704_v23 = vpop.f32.mrb[33].mxu1 }
 0x23c   :  { %v4705_v35 = vadd.f32 %v4704_v23, %v4703_v19  ;;  %v4706_v28 = vpop.f32.mrb[34].mxu1 }
 0x23d   :  { %v4707_v29 = vpop.f32.mrb[35].mxu1 }
 0x23e   :  { %v3962_v33 = vadd.f32 %v4705_v35, %v3921_v25  ;;  %v4708_v31 = vadd.f32 %v4707_v29, %v4706_v28 }
 0x240   :  { %v3965_v34 = vadd.f32 %v4708_v31, %v3924_v40 }
 0x25a   :  { %v4725_v30 = vpop.f32.mrb[36].mxu0 }
 0x25b   :  { %v4726_v36 = vpop.f32.mrb[37].mxu0 }
 0x25c   :  { %v4727_v37 = vadd.f32 %v4726_v36, %v4725_v30  ;;  %v4728_v39 = vpop.f32.mrb[38].mxu0 }
 0x25d   :  { %v4729_v8 = vpop.f32.mrb[39].mxu0 }
 0x25e   :  { %v4003_v42 = vadd.f32 %v4727_v37, %v3962_v33  ;;  %v4730_v43 = vadd.f32 %v4729_v8, %v4728_v39 }
 0x260   :  { %v4006_v44 = vadd.f32 %v4730_v43, %v3965_v34 }
 0x27a   :  { %v4747_v18 = vpop.f32.mrb[36].mxu1 }
 0x27b   :  { %v4748_v32 = vpop.f32.mrb[37].mxu1 }
 0x27c   :  { %v4749_v47 = vadd.f32 %v4748_v32, %v4747_v18  ;;  %v4750_v27 = vpop.f32.mrb[38].mxu1 }
 0x27d   :  { %v4751_v48 = vpop.f32.mrb[39].mxu1 }
 0x27e   :  { %v4044_v49 = vadd.f32 %v4749_v47, %v4003_v42  ;;  %v4752_v51 = vadd.f32 %v4751_v48, %v4750_v27 }
 0x280   :  { %v4047_v59 = vadd.f32 %v4752_v51, %v4006_v44 }
 0x29a   :  { %v4769_v45 = vpop.f32.mrb[40].mxu0 }
 0x29b   :  { %v4770_v56 = vpop.f32.mrb[41].mxu0 }
 0x29c   :  { %v4771_v57 = vadd.f32 %v4770_v56, %v4769_v45  ;;  %v4772_v38 = vpop.f32.mrb[42].mxu0 }
 0x29d   :  { %v4773_v58 = vpop.f32.mrb[43].mxu0 }
 0x29e   :  { %v4085_v50 = vadd.f32 %v4771_v57, %v4044_v49  ;;  %v4774_v61 = vadd.f32 %v4773_v58, %v4772_v38 }
 0x2a0   :  { %v4088_v9 = vadd.f32 %v4774_v61, %v4047_v59 }
 0x2ba   :  { %v4791_v41 = vpop.f32.mrb[40].mxu1 }
 0x2bb   :  { %v4792_v20 = vpop.f32.mrb[41].mxu1 }
 0x2bc   :  { %v4793_v53 = vadd.f32 %v4792_v20, %v4791_v41  ;;  %v4794_v1 = vpop.f32.mrb[42].mxu1 }
 0x2bd   :  { %v4795_v2 = vpop.f32.mrb[43].mxu1 }
 0x2be   :  { %v4126_v4 = vadd.f32 %v4793_v53, %v4085_v50  ;;  %v4796_v60 = vadd.f32 %v4795_v2, %v4794_v1 }
 0x2c0   :  { %v4129_v7 = vadd.f32 %v4796_v60, %v4088_v9 }
 0x2da   :  { %v4813_v55 = vpop.f32.mrb[44].mxu0 }
 0x2db   :  { %v4814_v62 = vpop.f32.mrb[45].mxu0 }
 0x2dc   :  { %v4815_v0 = vadd.f32 %v4814_v62, %v4813_v55  ;;  %v4816_v13 = vpop.f32.mrb[46].mxu0 }
 0x2dd   :  { %v4817_v11 = vpop.f32.mrb[47].mxu0 }
 0x2de   :  { %v4167_v15 = vadd.f32 %v4815_v0, %v4126_v4  ;;  %v4818_v46 = vadd.f32 %v4817_v11, %v4816_v13 }
 0x2e0   :  { %v4170_v12 = vadd.f32 %v4818_v46, %v4129_v7 }
 0x2fa   :  { %v4835_v5 = vpop.f32.mrb[44].mxu1 }
 0x2fb   :  { %v4836_v6 = vpop.f32.mrb[45].mxu1 }
 0x2fc   :  { %v4837_v54 = vadd.f32 %v4836_v6, %v4835_v5  ;;  %v4838_v14 = vpop.f32.mrb[46].mxu1 }
 0x2fd   :  { %v4839_v3 = vpop.f32.mrb[47].mxu1 }
 0x2fe   :  { %v4208_v17 = vadd.f32 %v4837_v54, %v4167_v15  ;;  %v4840_v16 = vadd.f32 %v4839_v3, %v4838_v14 }
 0x300   :  { %4214 = vst [vmem:[#allocation7] sm:$0xff] %v4208_v17  ;;  %v4211_v10 = vadd.f32 %v4840_v16, %v4170_v12 }
 0x302   :  { %4215 = vst [vmem:[#allocation7 + $0x8] sm:$0xff] %v4211_v10 }
 0x303   :  { %5165 = shalt.err (!%p5162_p6)
}
 0x304   :  { %s5166_s23 = scalar_lea.hbm %s5606_s6, 256 }
 0x305   :  { %p5167_p7 = scmp.ne.s32.totalorder %s5606_s6, %s5166_s23  ;;  %p5170_p8 = scmp.lt.u32.totalorder %s5166_s23, %s5606_s6 }
 0x307   :  { %p5172_p9 = pnand %p5170_p8, %p5167_p7 }
 0x309   :  { %5175 = shalt.err (!%p5172_p9)
}
 0x30a   :  { %s5190_s27 = smov 8  }
 0x30b   :  { %4227 = dma.vmem_to_hbm [thread:$0]  %s4222_s20, 256, %s5606_s6, [#allocation4], %s5184_s8, %s5184_s8, %s5190_s27  }
 0x30c   :  { %5180 = dma.done.wait [#allocation4], 256  }
 0x30d   :  { %5181 = vsyncadd [#allocation4], 4294967040 }
 0x30e   :  { %4231 = vsyncpa [#allocation3], 1 }
 0x30f   :  { %4232 = vsyncpa [#allocation6], 1 }
 0x310   :  { %4233 = vsyncpa [#allocation4], 1 }

</bundles_post_ra>
